<compile_context>
chip_gen: v7x
topology: tpu7x:2x2x1
jax: 0.10.0
libtpu: 0.0.40
codegen_flags: <defaults>
</compile_context>

<pallas_src>
import jax
import jax.numpy as jnp
from jax.experimental import pallas as pl
from jax.experimental.pallas import tpu as pltpu

C_IN, C_OUT = 26, 7
H, W, PAD = 16, 16, 2
HW = H * W
HP, WP = H + 2 * PAD, W + 2 * PAD


def conv1x1_pad_kernel(x_ref, w_ref, b_ref, other_ref, o_ref, y_ref):
    """1x1 conv + zero-padded output border + (bias + other), all in-kernel.

    x_ref:     (C_IN, HW)      VMEM  unpadded input, spatial dims flattened
    w_ref:     (C_OUT, C_IN)   VMEM  1x1 conv weight
    b_ref:     (C_OUT,)        SMEM  conv bias
    other_ref: (1, 1)          SMEM  scalar `other`
    o_ref:     (C_OUT, HP, WP) VMEM  padded output
    y_ref:     (C_OUT, HW)     VMEM  scratch for the lane-dense matmul result
    """
    other = other_ref[0, 0]

    # --- Border fill: pixels that only see zero padding equal bias[c] + other.
    #     Plain scalar splats (one contiguous store region per channel).
    for c in range(C_OUT):
        o_ref[c, :, :] = jnp.full((HP, WP), b_ref[c] + other, dtype=jnp.float32)

    # --- Per-channel bias as a (C_OUT, 1) vector built from SMEM scalars
    #     (sublane-aligned, broadcasts for free against the matmul result).
    ch = jax.lax.broadcasted_iota(jnp.int32, (C_OUT, 1), 0)
    bvec = jnp.zeros((C_OUT, 1), jnp.float32)
    for c in range(C_OUT):
        bvec = jnp.where(ch == c, b_ref[c], bvec)

    # --- Interior: 1x1 conv == (C_OUT, C_IN) @ (C_IN, H*W) on the MXU.
    y = jnp.dot(w_ref[...], x_ref[...], preferred_element_type=jnp.float32)
    y_ref[...] = y + bvec + other            # lane-dense (7, 256) store

    # --- Scatter the H interior image rows into the padded output,
    #     one contiguous W-wide store per row (v5e-friendly: row-contiguous).
    for r in range(H):
        o_ref[:, PAD + r, PAD:PAD + W] = y_ref[:, r * W:(r + 1) * W]


@jax.jit
def model_forward(x_nchw, weight, bias, other=0.0):
    """Equivalent of Model.forward: Conv2d(26,7,1,stride=1,padding=2)(x1) + other."""
    n, c_in, h, w = x_nchw.shape
    assert (n, c_in, h, w) == (1, C_IN, H, W)
    # TODO(synk): for batch N > 1, fold the batch into the lane dimension
    # (x -> (C_IN, N*H*W)) to amortize the per-call fixed overhead.

    x_flat = x_nchw.reshape(C_IN, HW).astype(jnp.float32)      # contiguous, free
    other_arr = jnp.asarray(other, dtype=jnp.float32).reshape(1, 1)

    vmem = pl.BlockSpec(memory_space=pltpu.MemorySpace.VMEM)
    smem = pl.BlockSpec(memory_space=pltpu.MemorySpace.SMEM)

    out = pl.pallas_call(
        conv1x1_pad_kernel,
        out_shape=jax.ShapeDtypeStruct((C_OUT, HP, WP), jnp.float32),
        in_specs=[vmem, vmem, smem, smem],
        out_specs=vmem,
        scratch_shapes=[pltpu.VMEM((C_OUT, HW), jnp.float32)],
        cost_estimate=pl.CostEstimate(
            flops=2 * C_OUT * C_IN * HW,
            bytes_accessed=4 * (C_IN * HW + C_OUT * C_IN + C_OUT + 1
                                + C_OUT * HP * WP),
            transcendentals=0,
        ),
    )(x_flat, weight.astype(jnp.float32), bias.astype(jnp.float32), other_arr)

    return out.reshape(1, C_OUT, HP, WP)      # metadata-only expand_dims


if __name__ == "__main__":
    key = jax.random.PRNGKey(0)
    k_x, k_w, k_b = jax.random.split(key, 3)

    # Deterministic synthetic parameters (roughly Conv2d's uniform init scale).
    bound = 1.0 / jnp.sqrt(jnp.float32(C_IN))
    weight = jax.random.uniform(k_w, (C_OUT, C_IN), jnp.float32, -bound, bound)
    bias = jax.random.uniform(k_b, (C_OUT,), jnp.float32, -bound, bound)
    x1 = jax.random.normal(k_x, (1, C_IN, H, W), dtype=jnp.float32)

    ok = True
    for other in (0.0, 1.5):
        out = jax.block_until_ready(model_forward(x1, weight, bias, other))

        # Reference: plain-JAX 1x1 conv on the zero-padded input, + bias + other.
        x_pad = jnp.pad(x1, ((0, 0), (0, 0), (PAD, PAD), (PAD, PAD)))
        ref = (jnp.einsum("nchw,oc->nohw", x_pad, weight)
               + bias[None, :, None, None] + other)

        ok &= out.shape == (1, C_OUT, HP, WP)
        ok &= bool(jnp.allclose(out, ref, atol=1e-5, rtol=1e-5))

    assert ok
    print("KERNEL_OK")
</pallas_src>

<mosaic_0001>
module attributes {stable_mosaic.version = 11 : i64} {
  func.func @conv1x1_pad_kernel(%arg0: memref<26x256xf32, #tpu.memory_space<vmem>>, %arg1: memref<7x26xf32, #tpu.memory_space<vmem>>, %arg2: memref<7xf32, #tpu.memory_space<smem>>, %arg3: memref<1x1xf32, #tpu.memory_space<smem>>, %arg4: memref<7x20x20xf32, #tpu.memory_space<vmem>>, %arg5: memref<7x256xf32, #tpu.memory_space<vmem>>) attributes {dimension_semantics = [], scalar_prefetch = 0 : i64, scratch_operands = 1 : i64, tpu.core_type = #tpu.core_type<tc>} {
    %c0 = arith.constant 0 : index
    %c0_0 = arith.constant 0 : index
    %0 = memref.load %arg3[%c0, %c0_0] : memref<1x1xf32, #tpu.memory_space<smem>>
    %c0_1 = arith.constant 0 : index
    %1 = memref.load %arg2[%c0_1] : memref<7xf32, #tpu.memory_space<smem>>
    %2 = arith.addf %1, %0 : f32
    %3 = vector.broadcast %2 : f32 to vector<20x20xf32>
    %c0_2 = arith.constant 0 : index
    %c0_3 = arith.constant 0 : index
    %c0_4 = arith.constant 0 : index
    %4 = vector.load %arg4[%c0_2, %c0_3, %c0_4] : memref<7x20x20xf32, #tpu.memory_space<vmem>>, vector<1x20x20xf32>
    %5 = vector.shape_cast %4 : vector<1x20x20xf32> to vector<20x20xf32>
    %6 = vector.shape_cast %3 : vector<20x20xf32> to vector<1x20x20xf32>
    tpu.vector_store %arg4[%c0_2, %c0_3, %c0_4], %6 {strides = array<i32>} : memref<7x20x20xf32, #tpu.memory_space<vmem>>, vector<1x20x20xf32>,
    %c1 = arith.constant 1 : index
    %7 = memref.load %arg2[%c1] : memref<7xf32, #tpu.memory_space<smem>>
    %8 = arith.addf %7, %0 : f32
    %9 = vector.broadcast %8 : f32 to vector<20x20xf32>
    %c1_5 = arith.constant 1 : index
    %c0_6 = arith.constant 0 : index
    %c0_7 = arith.constant 0 : index
    %10 = vector.load %arg4[%c1_5, %c0_6, %c0_7] : memref<7x20x20xf32, #tpu.memory_space<vmem>>, vector<1x20x20xf32>
    %11 = vector.shape_cast %10 : vector<1x20x20xf32> to vector<20x20xf32>
    %12 = vector.shape_cast %9 : vector<20x20xf32> to vector<1x20x20xf32>
    tpu.vector_store %arg4[%c1_5, %c0_6, %c0_7], %12 {strides = array<i32>} : memref<7x20x20xf32, #tpu.memory_space<vmem>>, vector<1x20x20xf32>,
    %c2 = arith.constant 2 : index
    %13 = memref.load %arg2[%c2] : memref<7xf32, #tpu.memory_space<smem>>
    %14 = arith.addf %13, %0 : f32
    %15 = vector.broadcast %14 : f32 to vector<20x20xf32>
    %c2_8 = arith.constant 2 : index
    %c0_9 = arith.constant 0 : index
    %c0_10 = arith.constant 0 : index
    %16 = vector.load %arg4[%c2_8, %c0_9, %c0_10] : memref<7x20x20xf32, #tpu.memory_space<vmem>>, vector<1x20x20xf32>
    %17 = vector.shape_cast %16 : vector<1x20x20xf32> to vector<20x20xf32>
    %18 = vector.shape_cast %15 : vector<20x20xf32> to vector<1x20x20xf32>
    tpu.vector_store %arg4[%c2_8, %c0_9, %c0_10], %18 {strides = array<i32>} : memref<7x20x20xf32, #tpu.memory_space<vmem>>, vector<1x20x20xf32>,
    %c3 = arith.constant 3 : index
    %19 = memref.load %arg2[%c3] : memref<7xf32, #tpu.memory_space<smem>>
    %20 = arith.addf %19, %0 : f32
    %21 = vector.broadcast %20 : f32 to vector<20x20xf32>
    %c3_11 = arith.constant 3 : index
    %c0_12 = arith.constant 0 : index
    %c0_13 = arith.constant 0 : index
    %22 = vector.load %arg4[%c3_11, %c0_12, %c0_13] : memref<7x20x20xf32, #tpu.memory_space<vmem>>, vector<1x20x20xf32>
    %23 = vector.shape_cast %22 : vector<1x20x20xf32> to vector<20x20xf32>
    %24 = vector.shape_cast %21 : vector<20x20xf32> to vector<1x20x20xf32>
    tpu.vector_store %arg4[%c3_11, %c0_12, %c0_13], %24 {strides = array<i32>} : memref<7x20x20xf32, #tpu.memory_space<vmem>>, vector<1x20x20xf32>,
    %c4 = arith.constant 4 : index
    %25 = memref.load %arg2[%c4] : memref<7xf32, #tpu.memory_space<smem>>
    %26 = arith.addf %25, %0 : f32
    %27 = vector.broadcast %26 : f32 to vector<20x20xf32>
    %c4_14 = arith.constant 4 : index
    %c0_15 = arith.constant 0 : index
    %c0_16 = arith.constant 0 : index
    %28 = vector.load %arg4[%c4_14, %c0_15, %c0_16] : memref<7x20x20xf32, #tpu.memory_space<vmem>>, vector<1x20x20xf32>
    %29 = vector.shape_cast %28 : vector<1x20x20xf32> to vector<20x20xf32>
    %30 = vector.shape_cast %27 : vector<20x20xf32> to vector<1x20x20xf32>
    tpu.vector_store %arg4[%c4_14, %c0_15, %c0_16], %30 {strides = array<i32>} : memref<7x20x20xf32, #tpu.memory_space<vmem>>, vector<1x20x20xf32>,
    %c5 = arith.constant 5 : index
    %31 = memref.load %arg2[%c5] : memref<7xf32, #tpu.memory_space<smem>>
    %32 = arith.addf %31, %0 : f32
    %33 = vector.broadcast %32 : f32 to vector<20x20xf32>
    %c5_17 = arith.constant 5 : index
    %c0_18 = arith.constant 0 : index
    %c0_19 = arith.constant 0 : index
    %34 = vector.load %arg4[%c5_17, %c0_18, %c0_19] : memref<7x20x20xf32, #tpu.memory_space<vmem>>, vector<1x20x20xf32>
    %35 = vector.shape_cast %34 : vector<1x20x20xf32> to vector<20x20xf32>
    %36 = vector.shape_cast %33 : vector<20x20xf32> to vector<1x20x20xf32>
    tpu.vector_store %arg4[%c5_17, %c0_18, %c0_19], %36 {strides = array<i32>} : memref<7x20x20xf32, #tpu.memory_space<vmem>>, vector<1x20x20xf32>,
    %c6 = arith.constant 6 : index
    %37 = memref.load %arg2[%c6] : memref<7xf32, #tpu.memory_space<smem>>
    %38 = arith.addf %37, %0 : f32
    %39 = vector.broadcast %38 : f32 to vector<20x20xf32>
    %c6_20 = arith.constant 6 : index
    %c0_21 = arith.constant 0 : index
    %c0_22 = arith.constant 0 : index
    %40 = vector.load %arg4[%c6_20, %c0_21, %c0_22] : memref<7x20x20xf32, #tpu.memory_space<vmem>>, vector<1x20x20xf32>
    %41 = vector.shape_cast %40 : vector<1x20x20xf32> to vector<20x20xf32>
    %42 = vector.shape_cast %39 : vector<20x20xf32> to vector<1x20x20xf32>
    tpu.vector_store %arg4[%c6_20, %c0_21, %c0_22], %42 {strides = array<i32>} : memref<7x20x20xf32, #tpu.memory_space<vmem>>, vector<1x20x20xf32>,
    %43 = tpu.iota {dimensions = array<i32: 0>} : vector<7x1xi32>
    %cst = arith.constant 0.000000e+00 : f32
    %44 = vector.broadcast %cst : f32 to vector<7x1xf32>
    %c0_i32 = arith.constant 0 : i32
    %45 = vector.broadcast %c0_i32 : i32 to vector<7x1xi32>
    %46 = arith.cmpi eq, %43, %45 : vector<7x1xi32>
    %c0_23 = arith.constant 0 : index
    %47 = memref.load %arg2[%c0_23] : memref<7xf32, #tpu.memory_space<smem>>
    %48 = vector.broadcast %47 : f32 to vector<7x1xf32>
    %49 = arith.select %46, %48, %44 : vector<7x1xi1>, vector<7x1xf32>
    %c1_i32 = arith.constant 1 : i32
    %50 = vector.broadcast %c1_i32 : i32 to vector<7x1xi32>
    %51 = arith.cmpi eq, %43, %50 : vector<7x1xi32>
    %c1_24 = arith.constant 1 : index
    %52 = memref.load %arg2[%c1_24] : memref<7xf32, #tpu.memory_space<smem>>
    %53 = vector.broadcast %52 : f32 to vector<7x1xf32>
    %54 = arith.select %51, %53, %49 : vector<7x1xi1>, vector<7x1xf32>
    %c2_i32 = arith.constant 2 : i32
    %55 = vector.broadcast %c2_i32 : i32 to vector<7x1xi32>
    %56 = arith.cmpi eq, %43, %55 : vector<7x1xi32>
    %c2_25 = arith.constant 2 : index
    %57 = memref.load %arg2[%c2_25] : memref<7xf32, #tpu.memory_space<smem>>
    %58 = vector.broadcast %57 : f32 to vector<7x1xf32>
    %59 = arith.select %56, %58, %54 : vector<7x1xi1>, vector<7x1xf32>
    %c3_i32 = arith.constant 3 : i32
    %60 = vector.broadcast %c3_i32 : i32 to vector<7x1xi32>
    %61 = arith.cmpi eq, %43, %60 : vector<7x1xi32>
    %c3_26 = arith.constant 3 : index
    %62 = memref.load %arg2[%c3_26] : memref<7xf32, #tpu.memory_space<smem>>
    %63 = vector.broadcast %62 : f32 to vector<7x1xf32>
    %64 = arith.select %61, %63, %59 : vector<7x1xi1>, vector<7x1xf32>
    %c4_i32 = arith.constant 4 : i32
    %65 = vector.broadcast %c4_i32 : i32 to vector<7x1xi32>
    %66 = arith.cmpi eq, %43, %65 : vector<7x1xi32>
    %c4_27 = arith.constant 4 : index
    %67 = memref.load %arg2[%c4_27] : memref<7xf32, #tpu.memory_space<smem>>
    %68 = vector.broadcast %67 : f32 to vector<7x1xf32>
    %69 = arith.select %66, %68, %64 : vector<7x1xi1>, vector<7x1xf32>
    %c5_i32 = arith.constant 5 : i32
    %70 = vector.broadcast %c5_i32 : i32 to vector<7x1xi32>
    %71 = arith.cmpi eq, %43, %70 : vector<7x1xi32>
    %c5_28 = arith.constant 5 : index
    %72 = memref.load %arg2[%c5_28] : memref<7xf32, #tpu.memory_space<smem>>
    %73 = vector.broadcast %72 : f32 to vector<7x1xf32>
    %74 = arith.select %71, %73, %69 : vector<7x1xi1>, vector<7x1xf32>
    %c6_i32 = arith.constant 6 : i32
    %75 = vector.broadcast %c6_i32 : i32 to vector<7x1xi32>
    %76 = arith.cmpi eq, %43, %75 : vector<7x1xi32>
    %c6_29 = arith.constant 6 : index
    %77 = memref.load %arg2[%c6_29] : memref<7xf32, #tpu.memory_space<smem>>
    %78 = vector.broadcast %77 : f32 to vector<7x1xf32>
    %79 = arith.select %76, %78, %74 : vector<7x1xi1>, vector<7x1xf32>
    %c0_30 = arith.constant 0 : index
    %c0_31 = arith.constant 0 : index
    %80 = vector.load %arg1[%c0_30, %c0_31] : memref<7x26xf32, #tpu.memory_space<vmem>>, vector<7x26xf32>
    %c0_32 = arith.constant 0 : index
    %c0_33 = arith.constant 0 : index
    %81 = vector.load %arg0[%c0_32, %c0_33] : memref<26x256xf32, #tpu.memory_space<vmem>>, vector<26x256xf32>
    %cst_34 = arith.constant dense<0.000000e+00> : vector<7x256xf32>
    %82 = tpu.matmul %80, %81, %cst_34 {dimension_numbers = #tpu.dot_dimension_numbers<[1], [0], [0], [1], [0, 0, 1, 1], [], []>} : vector<7x26xf32>, vector<26x256xf32>, vector<7x256xf32> -> vector<7x256xf32>
    %83 = vector.broadcast %79 : vector<7x1xf32> to vector<7x256xf32>
    %84 = arith.addf %82, %83 : vector<7x256xf32>
    %85 = vector.broadcast %0 : f32 to vector<7x256xf32>
    %86 = arith.addf %84, %85 : vector<7x256xf32>
    %c0_35 = arith.constant 0 : index
    %c0_36 = arith.constant 0 : index
    %87 = vector.load %arg5[%c0_35, %c0_36] : memref<7x256xf32, #tpu.memory_space<vmem>>, vector<7x256xf32>
    tpu.vector_store %arg5[%c0_35, %c0_36], %86 {strides = array<i32>} : memref<7x256xf32, #tpu.memory_space<vmem>>, vector<7x256xf32>,
    %c0_37 = arith.constant 0 : index
    %c0_38 = arith.constant 0 : index
    %88 = vector.load %arg5[%c0_37, %c0_38] : memref<7x256xf32, #tpu.memory_space<vmem>>, vector<7x16xf32>
    %c0_39 = arith.constant 0 : index
    %c2_40 = arith.constant 2 : index
    %c2_41 = arith.constant 2 : index
    %89 = vector.load %arg4[%c0_39, %c2_40, %c2_41] : memref<7x20x20xf32, #tpu.memory_space<vmem>>, vector<7x1x16xf32>
    %90 = vector.shape_cast %89 : vector<7x1x16xf32> to vector<7x16xf32>
    %91 = vector.shape_cast %88 : vector<7x16xf32> to vector<7x1x16xf32>
    tpu.vector_store %arg4[%c0_39, %c2_40, %c2_41], %91 {strides = array<i32>} : memref<7x20x20xf32, #tpu.memory_space<vmem>>, vector<7x1x16xf32>,
    %c0_42 = arith.constant 0 : index
    %c16 = arith.constant 16 : index
    %92 = vector.load %arg5[%c0_42, %c16] : memref<7x256xf32, #tpu.memory_space<vmem>>, vector<7x16xf32>
    %c0_43 = arith.constant 0 : index
    %c3_44 = arith.constant 3 : index
    %c2_45 = arith.constant 2 : index
    %93 = vector.load %arg4[%c0_43, %c3_44, %c2_45] : memref<7x20x20xf32, #tpu.memory_space<vmem>>, vector<7x1x16xf32>
    %94 = vector.shape_cast %93 : vector<7x1x16xf32> to vector<7x16xf32>
    %95 = vector.shape_cast %92 : vector<7x16xf32> to vector<7x1x16xf32>
    tpu.vector_store %arg4[%c0_43, %c3_44, %c2_45], %95 {strides = array<i32>} : memref<7x20x20xf32, #tpu.memory_space<vmem>>, vector<7x1x16xf32>,
    %c0_46 = arith.constant 0 : index
    %c32 = arith.constant 32 : index
    %96 = vector.load %arg5[%c0_46, %c32] : memref<7x256xf32, #tpu.memory_space<vmem>>, vector<7x16xf32>
    %c0_47 = arith.constant 0 : index
    %c4_48 = arith.constant 4 : index
    %c2_49 = arith.constant 2 : index
    %97 = vector.load %arg4[%c0_47, %c4_48, %c2_49] : memref<7x20x20xf32, #tpu.memory_space<vmem>>, vector<7x1x16xf32>
    %98 = vector.shape_cast %97 : vector<7x1x16xf32> to vector<7x16xf32>
    %99 = vector.shape_cast %96 : vector<7x16xf32> to vector<7x1x16xf32>
    tpu.vector_store %arg4[%c0_47, %c4_48, %c2_49], %99 {strides = array<i32>} : memref<7x20x20xf32, #tpu.memory_space<vmem>>, vector<7x1x16xf32>,
    %c0_50 = arith.constant 0 : index
    %c48 = arith.constant 48 : index
    %100 = vector.load %arg5[%c0_50, %c48] : memref<7x256xf32, #tpu.memory_space<vmem>>, vector<7x16xf32>
    %c0_51 = arith.constant 0 : index
    %c5_52 = arith.constant 5 : index
    %c2_53 = arith.constant 2 : index
    %101 = vector.load %arg4[%c0_51, %c5_52, %c2_53] : memref<7x20x20xf32, #tpu.memory_space<vmem>>, vector<7x1x16xf32>
    %102 = vector.shape_cast %101 : vector<7x1x16xf32> to vector<7x16xf32>
    %103 = vector.shape_cast %100 : vector<7x16xf32> to vector<7x1x16xf32>
    tpu.vector_store %arg4[%c0_51, %c5_52, %c2_53], %103 {strides = array<i32>} : memref<7x20x20xf32, #tpu.memory_space<vmem>>, vector<7x1x16xf32>,
    %c0_54 = arith.constant 0 : index
    %c64 = arith.constant 64 : index
    %104 = vector.load %arg5[%c0_54, %c64] : memref<7x256xf32, #tpu.memory_space<vmem>>, vector<7x16xf32>
    %c0_55 = arith.constant 0 : index
    %c6_56 = arith.constant 6 : index
    %c2_57 = arith.constant 2 : index
    %105 = vector.load %arg4[%c0_55, %c6_56, %c2_57] : memref<7x20x20xf32, #tpu.memory_space<vmem>>, vector<7x1x16xf32>
    %106 = vector.shape_cast %105 : vector<7x1x16xf32> to vector<7x16xf32>
    %107 = vector.shape_cast %104 : vector<7x16xf32> to vector<7x1x16xf32>
    tpu.vector_store %arg4[%c0_55, %c6_56, %c2_57], %107 {strides = array<i32>} : memref<7x20x20xf32, #tpu.memory_space<vmem>>, vector<7x1x16xf32>,
    %c0_58 = arith.constant 0 : index
    %c80 = arith.constant 80 : index
    %108 = vector.load %arg5[%c0_58, %c80] : memref<7x256xf32, #tpu.memory_space<vmem>>, vector<7x16xf32>
    %c0_59 = arith.constant 0 : index
    %c7 = arith.constant 7 : index
    %c2_60 = arith.constant 2 : index
    %109 = vector.load %arg4[%c0_59, %c7, %c2_60] : memref<7x20x20xf32, #tpu.memory_space<vmem>>, vector<7x1x16xf32>
    %110 = vector.shape_cast %109 : vector<7x1x16xf32> to vector<7x16xf32>
    %111 = vector.shape_cast %108 : vector<7x16xf32> to vector<7x1x16xf32>
    tpu.vector_store %arg4[%c0_59, %c7, %c2_60], %111 {strides = array<i32>} : memref<7x20x20xf32, #tpu.memory_space<vmem>>, vector<7x1x16xf32>,
    %c0_61 = arith.constant 0 : index
    %c96 = arith.constant 96 : index
    %112 = vector.load %arg5[%c0_61, %c96] : memref<7x256xf32, #tpu.memory_space<vmem>>, vector<7x16xf32>
    %c0_62 = arith.constant 0 : index
    %c8 = arith.constant 8 : index
    %c2_63 = arith.constant 2 : index
    %113 = vector.load %arg4[%c0_62, %c8, %c2_63] : memref<7x20x20xf32, #tpu.memory_space<vmem>>, vector<7x1x16xf32>
    %114 = vector.shape_cast %113 : vector<7x1x16xf32> to vector<7x16xf32>
    %115 = vector.shape_cast %112 : vector<7x16xf32> to vector<7x1x16xf32>
    tpu.vector_store %arg4[%c0_62, %c8, %c2_63], %115 {strides = array<i32>} : memref<7x20x20xf32, #tpu.memory_space<vmem>>, vector<7x1x16xf32>,
    %c0_64 = arith.constant 0 : index
    %c112 = arith.constant 112 : index
    %116 = vector.load %arg5[%c0_64, %c112] : memref<7x256xf32, #tpu.memory_space<vmem>>, vector<7x16xf32>
    %c0_65 = arith.constant 0 : index
    %c9 = arith.constant 9 : index
    %c2_66 = arith.constant 2 : index
    %117 = vector.load %arg4[%c0_65, %c9, %c2_66] : memref<7x20x20xf32, #tpu.memory_space<vmem>>, vector<7x1x16xf32>
    %118 = vector.shape_cast %117 : vector<7x1x16xf32> to vector<7x16xf32>
    %119 = vector.shape_cast %116 : vector<7x16xf32> to vector<7x1x16xf32>
    tpu.vector_store %arg4[%c0_65, %c9, %c2_66], %119 {strides = array<i32>} : memref<7x20x20xf32, #tpu.memory_space<vmem>>, vector<7x1x16xf32>,
    %c0_67 = arith.constant 0 : index
    %c128 = arith.constant 128 : index
    %120 = vector.load %arg5[%c0_67, %c128] : memref<7x256xf32, #tpu.memory_space<vmem>>, vector<7x16xf32>
    %c0_68 = arith.constant 0 : index
    %c10 = arith.constant 10 : index
    %c2_69 = arith.constant 2 : index
    %121 = vector.load %arg4[%c0_68, %c10, %c2_69] : memref<7x20x20xf32, #tpu.memory_space<vmem>>, vector<7x1x16xf32>
    %122 = vector.shape_cast %121 : vector<7x1x16xf32> to vector<7x16xf32>
    %123 = vector.shape_cast %120 : vector<7x16xf32> to vector<7x1x16xf32>
    tpu.vector_store %arg4[%c0_68, %c10, %c2_69], %123 {strides = array<i32>} : memref<7x20x20xf32, #tpu.memory_space<vmem>>, vector<7x1x16xf32>,
    %c0_70 = arith.constant 0 : index
    %c144 = arith.constant 144 : index
    %124 = vector.load %arg5[%c0_70, %c144] : memref<7x256xf32, #tpu.memory_space<vmem>>, vector<7x16xf32>
    %c0_71 = arith.constant 0 : index
    %c11 = arith.constant 11 : index
    %c2_72 = arith.constant 2 : index
    %125 = vector.load %arg4[%c0_71, %c11, %c2_72] : memref<7x20x20xf32, #tpu.memory_space<vmem>>, vector<7x1x16xf32>
    %126 = vector.shape_cast %125 : vector<7x1x16xf32> to vector<7x16xf32>
    %127 = vector.shape_cast %124 : vector<7x16xf32> to vector<7x1x16xf32>
    tpu.vector_store %arg4[%c0_71, %c11, %c2_72], %127 {strides = array<i32>} : memref<7x20x20xf32, #tpu.memory_space<vmem>>, vector<7x1x16xf32>,
    %c0_73 = arith.constant 0 : index
    %c160 = arith.constant 160 : index
    %128 = vector.load %arg5[%c0_73, %c160] : memref<7x256xf32, #tpu.memory_space<vmem>>, vector<7x16xf32>
    %c0_74 = arith.constant 0 : index
    %c12 = arith.constant 12 : index
    %c2_75 = arith.constant 2 : index
    %129 = vector.load %arg4[%c0_74, %c12, %c2_75] : memref<7x20x20xf32, #tpu.memory_space<vmem>>, vector<7x1x16xf32>
    %130 = vector.shape_cast %129 : vector<7x1x16xf32> to vector<7x16xf32>
    %131 = vector.shape_cast %128 : vector<7x16xf32> to vector<7x1x16xf32>
    tpu.vector_store %arg4[%c0_74, %c12, %c2_75], %131 {strides = array<i32>} : memref<7x20x20xf32, #tpu.memory_space<vmem>>, vector<7x1x16xf32>,
    %c0_76 = arith.constant 0 : index
    %c176 = arith.constant 176 : index
    %132 = vector.load %arg5[%c0_76, %c176] : memref<7x256xf32, #tpu.memory_space<vmem>>, vector<7x16xf32>
    %c0_77 = arith.constant 0 : index
    %c13 = arith.constant 13 : index
    %c2_78 = arith.constant 2 : index
    %133 = vector.load %arg4[%c0_77, %c13, %c2_78] : memref<7x20x20xf32, #tpu.memory_space<vmem>>, vector<7x1x16xf32>
    %134 = vector.shape_cast %133 : vector<7x1x16xf32> to vector<7x16xf32>
    %135 = vector.shape_cast %132 : vector<7x16xf32> to vector<7x1x16xf32>
    tpu.vector_store %arg4[%c0_77, %c13, %c2_78], %135 {strides = array<i32>} : memref<7x20x20xf32, #tpu.memory_space<vmem>>, vector<7x1x16xf32>,
    %c0_79 = arith.constant 0 : index
    %c192 = arith.constant 192 : index
    %136 = vector.load %arg5[%c0_79, %c192] : memref<7x256xf32, #tpu.memory_space<vmem>>, vector<7x16xf32>
    %c0_80 = arith.constant 0 : index
    %c14 = arith.constant 14 : index
    %c2_81 = arith.constant 2 : index
    %137 = vector.load %arg4[%c0_80, %c14, %c2_81] : memref<7x20x20xf32, #tpu.memory_space<vmem>>, vector<7x1x16xf32>
    %138 = vector.shape_cast %137 : vector<7x1x16xf32> to vector<7x16xf32>
    %139 = vector.shape_cast %136 : vector<7x16xf32> to vector<7x1x16xf32>
    tpu.vector_store %arg4[%c0_80, %c14, %c2_81], %139 {strides = array<i32>} : memref<7x20x20xf32, #tpu.memory_space<vmem>>, vector<7x1x16xf32>,
    %c0_82 = arith.constant 0 : index
    %c208 = arith.constant 208 : index
    %140 = vector.load %arg5[%c0_82, %c208] : memref<7x256xf32, #tpu.memory_space<vmem>>, vector<7x16xf32>
    %c0_83 = arith.constant 0 : index
    %c15 = arith.constant 15 : index
    %c2_84 = arith.constant 2 : index
    %141 = vector.load %arg4[%c0_83, %c15, %c2_84] : memref<7x20x20xf32, #tpu.memory_space<vmem>>, vector<7x1x16xf32>
    %142 = vector.shape_cast %141 : vector<7x1x16xf32> to vector<7x16xf32>
    %143 = vector.shape_cast %140 : vector<7x16xf32> to vector<7x1x16xf32>
    tpu.vector_store %arg4[%c0_83, %c15, %c2_84], %143 {strides = array<i32>} : memref<7x20x20xf32, #tpu.memory_space<vmem>>, vector<7x1x16xf32>,
    %c0_85 = arith.constant 0 : index
    %c224 = arith.constant 224 : index
    %144 = vector.load %arg5[%c0_85, %c224] : memref<7x256xf32, #tpu.memory_space<vmem>>, vector<7x16xf32>
    %c0_86 = arith.constant 0 : index
    %c16_87 = arith.constant 16 : index
    %c2_88 = arith.constant 2 : index
    %145 = vector.load %arg4[%c0_86, %c16_87, %c2_88] : memref<7x20x20xf32, #tpu.memory_space<vmem>>, vector<7x1x16xf32>
    %146 = vector.shape_cast %145 : vector<7x1x16xf32> to vector<7x16xf32>
    %147 = vector.shape_cast %144 : vector<7x16xf32> to vector<7x1x16xf32>
    tpu.vector_store %arg4[%c0_86, %c16_87, %c2_88], %147 {strides = array<i32>} : memref<7x20x20xf32, #tpu.memory_space<vmem>>, vector<7x1x16xf32>,
    %c0_89 = arith.constant 0 : index
    %c240 = arith.constant 240 : index
    %148 = vector.load %arg5[%c0_89, %c240] : memref<7x256xf32, #tpu.memory_space<vmem>>, vector<7x16xf32>
    %c0_90 = arith.constant 0 : index
    %c17 = arith.constant 17 : index
    %c2_91 = arith.constant 2 : index
    %149 = vector.load %arg4[%c0_90, %c17, %c2_91] : memref<7x20x20xf32, #tpu.memory_space<vmem>>, vector<7x1x16xf32>
    %150 = vector.shape_cast %149 : vector<7x1x16xf32> to vector<7x16xf32>
    %151 = vector.shape_cast %148 : vector<7x16xf32> to vector<7x1x16xf32>
    tpu.vector_store %arg4[%c0_90, %c17, %c2_91], %151 {strides = array<i32>} : memref<7x20x20xf32, #tpu.memory_space<vmem>>, vector<7x1x16xf32>,
    return
  }
}

</mosaic_0001>

<bundles_post_ra>
// kernel: model_forward.1
= control target key start
LH: loop header
LB: loop body
LE: loop exit
PB: predicated region body
PF: predicated region fallthrough
CT: control target
= control target key end

     0   :  { %10 = vsyncpa [#allocation5], 0  ;;  %s3447_s0 = inlined_call_operand.vmem [shape: f32[26,256], index: 0, kind: input, shape index: {}]   ;;  %s3448_s1 = inlined_call_operand.vmem [shape: f32[7,26], index: 1, kind: input, shape index: {}]   ;;  %s3449_s2 = inlined_call_operand.vmem [shape: f32[7], index: 2, kind: input, shape index: {}]   ;;  %s3450_s3 = inlined_call_operand.<no memory space> [shape: f32[1,1], index: 3, kind: input, shape index: {}]   ;;  %s3451_s4 = inlined_call_operand.vmem [shape: f32[7,20,20], index: 4, kind: output, shape index: {}]  }
   0x1   :  { %s21_s17 = sshll.u32 %s3449_s2, 4  ;;  %s22_s17 = int_to_ptr.vmem [resolvable:$true] %s21_s17 }
   0x2   :  { %s1979_s18 = scalar_lea.vmem %s22_s17, 16  ;;  %p1984_p1 = scmp.lt.s32.totalorder %s22_s17, %s22_s17 }
   0x3   :  { %p1980_p0 = scmp.ne.s32.totalorder %s22_s17, %s1979_s18  ;;  %p1985_p2 = scmp.lt.s32.totalorder %s1979_s18, %s1979_s18 }
   0x5   :  { %p1986_p3 = por %p1985_p2, %p1984_p1 }
   0x7   :  { %p1987_p4 = pnand %p1986_p3, %p1980_p0 }
   0x9   :  { %1990 = shalt.err (!%p1987_p4)
}
   0xa   :  { %s1993_s19 = smov [#allocation4]  }
   0xb   :  { %24 = dma.vmem_to_smem %s22_s17, 16, %s1993_s19, [#allocation5]  }
   0xc   :  { %1991 = dma.done.wait [#allocation5], 16  }
   0xd   :  { %1992 = vsyncadd [#allocation5], 4294967280 }
   0xe   :  { %30 = sfence }
   0xf   :  { %v114_v0 = vld [vmem:[%s3447_s0 + $0x8] sm:$0xff]  ;;  %v116_v1 = vld [vmem:[%s3447_s0 + $0x18] sm:$0xff]  ;;  %v113_v2 = vld [vmem:[%s3447_s0] sm:$0xff]  ;;  %vm125_vm0 = vcmask 1041408   ;;  %v1994_v7 = vmov 0.0   ;;  %vm1995_vm1 = vmmov 1   ;;  %v82_v14 = vlaneseq }
  0x10   :  { %v1943_v3 = vpack.c.bf16 %v116_v1, %v114_v0  ;;  %v115_v4 = vld [vmem:[%s3447_s0 + $0x10] sm:$0xff]  ;;  %v118_v5 = vld [vmem:[%s3447_s0 + $0x28] sm:$0xff]  ;;  %v120_v6 = vld [vmem:[%s3447_s0 + $0x38] sm:$0x3]  ;;  %196 = vmatprep.mubr.f32.mxu0 %v1994_v7  ;;  %vm121_vm3 = vcmask 211968   ;;  %s2060_s11 = sld [smem:[#allocation4]]  ;;  %v203_v31 = vstv %s3450_s3 }
  0x11   :  { %v1945_v8 = vpack.c.bf16 %v115_v4, %v113_v2  ;;  %v1947_v9 = vpack.c.bf16 %v120_v6, %v118_v5  ;;  %vm1948_vm2 = vmpackc.low %vm125_vm0, %vm1995_vm1  ;;  %v117_v10 = vld [vmem:[%s3447_s0 + $0x20] sm:$0xff]  ;;  %v119_v11 = vld [vmem:[%s3447_s0 + $0x30] sm:$0x3]  ;;  %s2062_s12 = sld [smem:[#allocation4 + $0x1]]  ;;  %v83_v15 = vshrl.u32 %v82_v14, 7  ;;  %s2064_s0 = sld [smem:[#allocation4 + $0x2]] }
  0x12   :  { %1944 = vmatprep.subr.bf16.mxu0 %v1943_v3  ;;  %v1950_v12 = vpack.c.bf16 %v119_v11, %v117_v10  ;;  %v112_v13 = vld [vmem:[%s3448_s1] sm:$0x7f]  ;;  %s1936_s13 = sld [smem:[#allocation4 + $0x3]]  ;;  %s2068_s1 = sld [smem:[#allocation4 + $0x4]]  ;;  %v1996_v33 = vmov 1966171168  }
  0x13   :  { %1946 = vmatpush1.bf16.msra.mxu0 %v1945_v8  ;;  %vm84_vm4 = vcmp.eq.s32.totalorder %v83_v15, 0  ;;  %vm88_vm5 = vcmp.eq.s32.totalorder %v83_v15, 1  ;;  %vm92_vm6 = vcmp.eq.s32.totalorder %v83_v15, 2  ;;  %s1938_s14 = sld [smem:[#allocation4 + $0x5]]  ;;  %vm96_vm7 = vcmp.eq.s32.totalorder %v83_v15, 3  ;;  %s1939_s15 = sld [smem:[#allocation4 + $0x6]] }
  0x14   :  { %1949 = vmatprep.subr.msk.bf16.mxu0 %vm1948_vm2, %v1947_v9  ;;  %vm100_vm8 = vcmp.eq.s32.totalorder %v83_v15, 4  ;;  %vm104_vm9 = vcmp.eq.s32.totalorder %v83_v15, 5  ;;  %vm108_vm10 = vcmp.eq.s32.totalorder %v83_v15, 6  ;;  %v212_v34 = vunpack.c.l.s4 %v1996_v33  ;;  %s1997_s24 = smov 114   ;;  %s1998_s25 = smov 2  }
  0x15   :  { %vm35_vm11 = vcmask 162816   ;;  %v2093_v42 = vsub.s32 0, %v83_v15  ;;  %s1999_s26 = smov 82   ;;  %s2000_s27 = smov 98   ;;  %vm38_vm12 = vcmask 158720   ;;  %vm307_vm13 = vcmask 139280  }
  0x16   :  { %v86_v16 = vstv %s2060_s11  ;;  %v213_v39 = vunpack.c.0.s8 %v212_v34  ;;  %s33_s20 = sadd.f32 %s2060_s11, %s3450_s3  ;;  %s2001_s28 = smov 50  }
  0x17   :  { %1952 = vmatpush1.bf16.msk.msra.mxu0 %vm1948_vm2, %v1950_v12  ;;  %v87_v17 = vsel %vm84_vm4, %v86_v16, 0.0  ;;  %v90_v18 = vstv %s2062_s12  ;;  %v94_v20 = vstv %s2064_s0  ;;  %s2002_s29 = smov 66   ;;  %s2003_s30 = smov 18  }
  0x18   :  { %v91_v19 = vsel %vm88_vm5, %v90_v18, %v87_v17  ;;  %v98_v22 = vstv %s1936_s13  ;;  %v102_v24 = vstv %s2068_s1  ;;  %v2079_v40 = vstv %s33_s20  ;;  %s2004_s5 = smov 34   ;;  %s48_s10 = sadd.f32 %s2064_s0, %s3450_s3 }
  0x19   :  { %v95_v21 = vsel %vm92_vm6, %v94_v20, %v91_v19  ;;  %v106_v26 = vstv %s1938_s14  ;;  %v110_v28 = vstv %s1939_s15  ;;  %36 = vst.msk [vmem:[%s3451_s4] sm:$0xff] %vm35_vm11, %v2079_v40  ;;  %37 = vst.msk [vmem:[%s3451_s4 + $0x8] sm:$0xff] %vm35_vm11, %v2079_v40  ;;  %v2091_v41 = vsub.s32 %v213_v39, %v83_v15  ;;  %s41_s14 = sadd.f32 %s2062_s12, %s3450_s3  ;;  %s1918_s15 = sld [smem:[#allocation4 + $0x3]] }
  0x1a   :  { %1942 = vmatmul.mubr.msk.f32.vlgmr.msra.gmra.mrb[0].mxu0 %vm121_vm3, %v112_v13  ;;  %v99_v23 = vsel %vm96_vm7, %v98_v22, %v95_v21  ;;  %39 = vst.msk [vmem:[%s3451_s4 + $0x10] sm:$0xf] %vm38_vm12, %v2079_v40  ;;  %s62_s21 = sadd.f32 %s2068_s1, %s3450_s3  ;;  %s2728_s19 = sld [smem:[#allocation4 + $0x6]] }
  0x1b   :  { %v103_v25 = vsel %vm100_vm8, %v102_v24, %v99_v23  ;;  %s2750_s23 = sld [smem:[#allocation4 + $0x5]] }
  0x1c   :  { %v107_v27 = vsel %vm104_vm9, %v106_v26, %v103_v25 }
  0x1d   :  { %v111_v29 = vsel %vm108_vm10, %v110_v28, %v107_v27 }
  0x1f   :  { %s55_s7 = sadd.f32 %s1918_s15, %s3450_s3 }
  0x20   :  { %s76_s9 = sadd.f32 %s2728_s19, %s3450_s3 }
  0x21   :  { %s69_s1 = sadd.f32 %s2750_s23, %s3450_s3 }
  0xed   :  { %v198_v30 = vpop.f32.mrb[0].mxu0 }
  0xee   :  { %v199_v32 = vadd.f32 %v198_v30, %v111_v29  ;;  %v200_v35 = vpop.f32.mrb[1].mxu0 }
  0xef   :  { %v201_v36 = vadd.f32 %v200_v35, %v111_v29 }
  0xf0   :  { %v204_v37 = vadd.f32 %v203_v31, %v199_v32 }
  0xf1   :  { %v205_v38 = vadd.f32 %v203_v31, %v201_v36 }
  0xf2   :  { %206 = vst [vmem:[#allocation2] sm:$0x7f] %v204_v37  ;;  %v49_v37 = vstv %s48_s10 }
  0xf3   :  { %207 = vst [vmem:[#allocation2 + $0x8] sm:$0x7f] %v205_v38  ;;  %1915 = vst.msk [vmem:[%s3451_s4 + $0x30] sm:$0xff] %vm35_vm11, %v49_v37 }
  0xf4   :  { %1916 = vst.msk [vmem:[%s3451_s4 + $0x38] sm:$0xff] %vm35_vm11, %v49_v37 }
  0xf5   :  { %1917 = vst.msk [vmem:[%s3451_s4 + $0x40] sm:$0xf] %vm38_vm12, %v49_v37 }
  0xf9   :  { %v2095_v43 = vld [vmem:[#allocation2] sm:$0x7f] }
  0xfa   :  { %v2097_v44 = vld [vmem:[#allocation2] sm:$0x7f]  ;;  %v2103_v46 = vrot.slane %v2095_v43, %v2091_v41  ;;  %v2177_v5 = vld [vmem:[#allocation2 + $0x8] sm:$0x7f] }
  0xfb   :  { %v2099_v45 = vld [vmem:[#allocation2] sm:$0x7f]  ;;  %v2107_v47 = vrot.slane %v2097_v44, %v2091_v41  ;;  %v2179_v6 = vld [vmem:[#allocation2 + $0x8] sm:$0x7f]  ;;  %v2197_v11 = vrot.slane %v2177_v5, %v2091_v41  ;;  %v210_v38 = vcombine.high %v2097_v44, %v2097_v44 }
  0xfc   :  { %v2109_v48 = vld [vmem:[#allocation2] sm:$0x7f]  ;;  %v2117_v51 = vrot.slane %v2099_v45, %v2091_v41  ;;  %v2125_v53 = vrot.slane %v2103_v46, %v2091_v41  ;;  %v2201_v12 = vrot.slane %v2179_v6, %v2091_v41  ;;  %v2203_v13 = vld [vmem:[#allocation2 + $0x8] sm:$0x7f] }
  0xfd   :  { %v2111_v49 = vld [vmem:[#allocation2] sm:$0x7f]  ;;  %v2121_v52 = vrot.slane %v2109_v48, %v2091_v41  ;;  %v2129_v54 = vrot.slane %v2107_v47, %v2091_v41  ;;  %v2205_v14 = vld [vmem:[#allocation2 + $0x8] sm:$0x7f]  ;;  %v2211_v15 = vrot.slane %v2203_v13, %v2091_v41  ;;  %v2223_v19 = vrot.slane %v2197_v11, %v2091_v41 }
  0xfe   :  { %v2113_v50 = vld [vmem:[#allocation2] sm:$0x7f]  ;;  %v2133_v55 = vrot.slane %v2111_v49, %v2091_v41  ;;  %v368_v57 = vrot.slane %v2125_v53, %v2093_v42  ;;  %v2145_v59 = vrot.slane %v2117_v51, %v2091_v41  ;;  %v2215_v16 = vrot.slane %v2205_v14, %v2091_v41  ;;  %v2229_v21 = vld [vmem:[#allocation2 + $0x8] sm:$0x7f] }
  0xff   :  { %v2137_v56 = vrot.slane %v2113_v50, %v2091_v41  ;;  %v261_v58 = vrot.slane %v2129_v54, %v2093_v42  ;;  %v2149_v60 = vrot.slane %v2121_v52, %v2091_v41  ;;  %v2151_v61 = vld [vmem:[#allocation2] sm:$0x7f]  ;;  %v2227_v20 = vrot.slane %v2201_v12, %v2091_v41  ;;  %v2231_v22 = vld [vmem:[#allocation2 + $0x8] sm:$0x7f] }
 0x100   :  { %v2153_v62 = vld [vmem:[#allocation2] sm:$0x7f]  ;;  %393 = vrot.lane.b32.xlu1 %v368_v57, %s1997_s24  ;;  %v2159_v63 = vrot.slane %v2133_v55, %v2091_v41  ;;  %v580_v1 = vrot.slane %v2145_v59, %v2093_v42  ;;  %v2171_v3 = vrot.slane %v2151_v61, %v2091_v41  ;;  %v2237_v23 = vrot.slane %v2211_v15, %v2091_v41  ;;  %v2255_v29 = vld [vmem:[#allocation2 + $0x8] sm:$0x7f] }
 0x101   :  { %286 = vrot.lane.b32.xlu0 %v261_v58, %s1998_s25  ;;  %v2163_v0 = vrot.slane %v2137_v56, %v2091_v41  ;;  %v474_v2 = vrot.slane %v2149_v60, %v2093_v42  ;;  %v2175_v4 = vrot.slane %v2153_v62, %v2091_v41  ;;  %v2241_v24 = vrot.slane %v2229_v21, %v2091_v41  ;;  %v2257_v30 = vld [vmem:[#allocation2 + $0x8] sm:$0x7f] }
 0x102   :  { %v792_v7 = vrot.slane %v2159_v63, %v2093_v42  ;;  %v2189_v9 = vrot.slane %v2171_v3, %v2091_v41  ;;  %v1216_v25 = vrot.slane %v2223_v19, %v2093_v42  ;;  %v1110_v26 = vrot.slane %v2227_v20, %v2093_v42 }
 0x103   :  { %v686_v8 = vrot.slane %v2163_v0, %v2093_v42  ;;  %v2193_v10 = vrot.slane %v2175_v4, %v2091_v41  ;;  %v2249_v27 = vrot.slane %v2215_v16, %v2091_v41  ;;  %v2253_v28 = vrot.slane %v2231_v22, %v2091_v41 }
 0x104   :  { %605 = vrot.lane.b32.xlu1 %v580_v1, %s1999_s26  ;;  %v1004_v17 = vrot.slane %v2189_v9, %v2093_v42  ;;  %v1428_v31 = vrot.slane %v2237_v23, %v2093_v42  ;;  %v2265_v32 = vrot.slane %v2241_v24, %v2091_v41  ;;  %v2280_v35 = vrot.slane %v2255_v29, %v2091_v41 }
 0x105   :  { %499 = vrot.lane.b32.xlu0 %v474_v2, %s2000_s27  ;;  %v898_v18 = vrot.slane %v2193_v10, %v2093_v42  ;;  %v1322_v33 = vrot.slane %v2249_v27, %v2093_v42  ;;  %v2276_v34 = vrot.slane %v2253_v28, %v2091_v41  ;;  %v2284_v36 = vrot.slane %v2257_v30, %v2091_v41 }
 0x106   :  { %v225_v39 = vcombine.high %v2107_v47, %v2107_v47  ;;  %v1640_v40 = vrot.slane %v2265_v32, %v2093_v42  ;;  %v2318_v47 = vrot.slane %v2280_v35, %v2091_v41  ;;  %v42_v58 = vstv %s41_s14 }
 0x107   :  { %v1534_v44 = vrot.slane %v2276_v34, %v2093_v42  ;;  %v2322_v57 = vrot.slane %v2284_v36, %v2091_v41  ;;  %v317_v1 = vcombine.high %v2095_v43, %v2095_v43  ;;  %v255_v2 = vcombine.high %v2129_v54, %v2129_v54  ;;  %1911 = vst.msk [vmem:[%s3451_s4 + $0x18] sm:$0xff] %vm35_vm11, %v42_v58 }
 0x108   :  { %817 = vrot.lane.b32.xlu1 %v792_v7, %s2001_s28  ;;  %1912 = vst.msk [vmem:[%s3451_s4 + $0x20] sm:$0xff] %vm35_vm11, %v42_v58  ;;  %v1852_v43 = vrot.slane %v2318_v47, %v2093_v42  ;;  %v2351_v7 = vrot.slane %v225_v39, %v2091_v41 }
 0x109   :  { %711 = vrot.lane.b32.xlu0 %v686_v8, %s2002_s29  ;;  %1913 = vst.msk [vmem:[%s3451_s4 + $0x28] sm:$0xf] %vm38_vm12, %v42_v58  ;;  %v1746_v54 = vrot.slane %v2322_v57, %v2093_v42  ;;  %v2354_v8 = vrot.slane %v210_v38, %v2091_v41 }
 0x10c   :  { %1029 = vrot.lane.b32.xlu1 %v1004_v17, %s2003_s30  ;;  %v63_v17 = vstv %s62_s21 }
 0x10d   :  { %923 = vrot.lane.b32.xlu0 %v898_v18, %s2004_s5  ;;  %v362_v18 = vcombine.high %v2125_v53, %v2125_v53  ;;  %1923 = vst.msk [vmem:[%s3451_s4 + $0x60] sm:$0xff] %vm35_vm11, %v63_v17  ;;  %1924 = vst.msk [vmem:[%s3451_s4 + $0x68] sm:$0xff] %vm35_vm11, %v63_v17  ;;  %v332_v53 = vcombine.high %v2103_v46, %v2103_v46 }
 0x10e   :  { %1925 = vst.msk [vmem:[%s3451_s4 + $0x70] sm:$0xf] %vm38_vm12, %v63_v17 }
 0x10f   :  { %v376_v37 = vrot.slane %v362_v18, %v2093_v42  ;;  %v2394_v39 = vrot.slane %v332_v53, %v2091_v41 }
 0x110   :  { %1241 = vrot.lane.b32.xlu1 %v1216_v25, %s1997_s24  ;;  %v2361_v25 = vrot.slane %v317_v1, %v2091_v41  ;;  %v468_v1 = vcombine.high %v2149_v60, %v2149_v60  ;;  %v574_v60 = vcombine.high %v2145_v59, %v2145_v59  ;;  %v650_v59 = vcombine.high %v2137_v56, %v2137_v56 }
 0x111   :  { %1135 = vrot.lane.b32.xlu0 %v1110_v26, %s1998_s25  ;;  %v269_v26 = vrot.slane %v255_v2, %v2093_v42  ;;  %v372_v2 = vrot.slane %v2394_v39, %v2093_v42  ;;  %v680_v56 = vcombine.high %v2163_v0, %v2163_v0  ;;  %v786_v0 = vcombine.high %v2159_v63, %v2159_v63 }
 0x112   :  { %v2389_v38 = vrot.slane %v2361_v25, %v2091_v41  ;;  %v862_v63 = vcombine.high %v2175_v4, %v2175_v4  ;;  %v892_v4 = vcombine.high %v2193_v10, %v2193_v10  ;;  %v998_v10 = vcombine.high %v2189_v9, %v2189_v9 }
 0x113   :  { %v1074_v9 = vcombine.high %v2201_v12, %v2201_v12  ;;  %v1104_v12 = vcombine.high %v2227_v20, %v2227_v20  ;;  %v1180_v20 = vcombine.high %v2197_v11, %v2197_v11 }
 0x114   :  { %1453 = vrot.lane.b32.xlu1 %v1428_v31, %s1999_s26  ;;  %v265_v31 = vrot.slane %v2351_v7, %v2093_v42  ;;  %v384_v58 = vrot.slane %v2389_v38, %v2093_v42 }
 0x115   :  { %1347 = vrot.lane.b32.xlu0 %v1322_v33, %s2000_s27  ;;  %v2382_v33 = vrot.slane %v2354_v8, %v2091_v41  ;;  %v2580_v11 = vrot.slane %v1180_v20, %v2091_v41  ;;  %v1392_v20 = vcombine.high %v2211_v15, %v2211_v15  ;;  %v1483_v15 = vcombine.high %v2231_v22, %v2231_v22 }
 0x116   :  { %v1589_v22 = vcombine.high %v2229_v21, %v2229_v21  ;;  %v1604_v21 = vcombine.high %v2241_v24, %v2241_v24  ;;  %v1695_v24 = vcombine.high %v2257_v30, %v2257_v30  ;;  %v1801_v30 = vcombine.high %v2255_v29, %v2255_v29 }
 0x117   :  { %v277_v46 = vrot.slane %v2382_v33, %v2093_v42 }
 0x118   :  { %1665 = vrot.lane.b32.xlu1 %v1640_v40, %s2001_s28  ;;  %v438_v40 = vcombine.high %v2121_v52, %v2121_v52  ;;  %v2716_v29 = vrot.slane %v1801_v30, %v2091_v41 }
 0x119   :  { %1559 = vrot.lane.b32.xlu0 %v1534_v44, %s2002_s29  ;;  %v423_v44 = vcombine.high %v2109_v48, %v2109_v48  ;;  %v529_v48 = vcombine.high %v2099_v45, %v2099_v45  ;;  %v544_v45 = vcombine.high %v2117_v51, %v2117_v51  ;;  %v635_v51 = vcombine.high %v2113_v50, %v2113_v50 }
 0x11a   :  { %v741_v50 = vcombine.high %v2111_v49, %v2111_v49  ;;  %v756_v49 = vcombine.high %v2133_v55, %v2133_v55  ;;  %v847_v55 = vcombine.high %v2153_v62, %v2153_v62  ;;  %v953_v62 = vcombine.high %v2151_v61, %v2151_v61 }
 0x11b   :  { %v2412_v52 = vrot.slane %v423_v44, %v2091_v41  ;;  %v2428_v53 = vrot.slane %v529_v48, %v2091_v41  ;;  %v968_v61 = vcombine.high %v2171_v3, %v2171_v3  ;;  %v1059_v3 = vcombine.high %v2179_v6, %v2179_v6 }
 0x11c   :  { %1877 = vrot.lane.b32.xlu1 %v1852_v43, %s2003_s30  ;;  %v2409_v43 = vrot.slane %v438_v40, %v2091_v41  ;;  %v2451_v40 = vrot.slane %v650_v59, %v2091_v41  ;;  %v2492_v59 = vrot.slane %v756_v49, %v2091_v41  ;;  %v1165_v6 = vcombine.high %v2177_v5, %v2177_v5 }
 0x11d   :  { %1771 = vrot.lane.b32.xlu0 %v1746_v54, %s2004_s5  ;;  %v482_v54 = vrot.slane %v468_v1, %v2093_v42  ;;  %v2425_v18 = vrot.slane %v2412_v52, %v2091_v41  ;;  %v2460_v1 = vrot.slane %v635_v51, %v2091_v41 }
 0x11e   :  { %v478_v17 = vrot.slane %v2409_v43, %v2093_v42  ;;  %v690_v48 = vrot.slane %v2451_v40, %v2093_v42  ;;  %v2574_v5 = vrot.slane %v1165_v6, %v2091_v41 }
 0x120   :  { %290 = vrot.lane.b32.xlu1 %v269_v26, %s1998_s25  ;;  %v588_v26 = vrot.slane %v574_v60, %v2093_v42  ;;  %v2476_v60 = vrot.slane %v741_v50, %v2091_v41 }
 0x121   :  { %288 = vrot.lane.b32.xlu0 %v265_v31, %s1998_s25  ;;  %v490_v31 = vrot.slane %v2425_v18, %v2093_v42 }
 0x124   :  { %397 = vrot.lane.b32.xlu1 %v376_v37, %s1997_s24  ;;  %v2441_v37 = vrot.slane %v2428_v53, %v2091_v41 }
 0x125   :  { %294 = vrot.lane.b32.xlu0 %v277_v46, %s1998_s25  ;;  %v2444_v46 = vrot.slane %v544_v45, %v2091_v41 }
 0x126   :  { %v596_v44 = vrot.slane %v2441_v37, %v2093_v42 }
 0x128   :  { %401 = vrot.lane.b32.xlu1 %v384_v58, %s1997_s24  ;;  %v584_v58 = vrot.slane %v2444_v46, %v2093_v42 }
 0x129   :  { %395 = vrot.lane.b32.xlu0 %v372_v2, %s1997_s24  ;;  %v694_v2 = vrot.slane %v680_v56, %v2093_v42  ;;  %v796_v56 = vrot.slane %v2492_v59, %v2093_v42 }
 0x12c   :  { %501 = vrot.lane.b32.xlu1 %v478_v17, %s2000_s27  ;;  %v800_v17 = vrot.slane %v786_v0, %v2093_v42  ;;  %v2524_v0 = vrot.slane %v953_v62, %v2091_v41 }
 0x12d   :  { %503 = vrot.lane.b32.xlu0 %v482_v54, %s2000_s27  ;;  %v2473_v54 = vrot.slane %v2460_v1, %v2091_v41 }
 0x12f   :  { %v702_v45 = vrot.slane %v2473_v54, %v2093_v42 }
 0x130   :  { %609 = vrot.lane.b32.xlu1 %v588_v26, %s1999_s26  ;;  %v2489_v26 = vrot.slane %v2476_v60, %v2091_v41 }
 0x131   :  { %507 = vrot.lane.b32.xlu0 %v490_v31, %s2000_s27  ;;  %v2499_v31 = vrot.slane %v862_v63, %v2091_v41  ;;  %v2540_v63 = vrot.slane %v968_v61, %v2091_v41  ;;  %v2586_v61 = vrot.slane %v2574_v5, %v2091_v41 }
 0x132   :  { %v808_v51 = vrot.slane %v2489_v26, %v2093_v42 }
 0x133   :  { %v902_v50 = vrot.slane %v2499_v31, %v2093_v42 }
 0x134   :  { %613 = vrot.lane.b32.xlu1 %v596_v44, %s1999_s26  ;;  %v2508_v44 = vrot.slane %v847_v55, %v2091_v41 }
 0x135   :  { %607 = vrot.lane.b32.xlu0 %v584_v58, %s1999_s26  ;;  %v906_v58 = vrot.slane %v892_v4, %v2093_v42  ;;  %v1008_v4 = vrot.slane %v2540_v63, %v2093_v42 }
 0x138   :  { %713 = vrot.lane.b32.xlu1 %v690_v48, %s2002_s29  ;;  %v1012_v48 = vrot.slane %v998_v10, %v2093_v42 }
 0x139   :  { %715 = vrot.lane.b32.xlu0 %v694_v2, %s2002_s29  ;;  %v2521_v2 = vrot.slane %v2508_v44, %v2091_v41 }
 0x13b   :  { %v914_v49 = vrot.slane %v2521_v2, %v2093_v42 }
 0x13c   :  { %821 = vrot.lane.b32.xlu1 %v800_v17, %s2001_s28  ;;  %v2537_v17 = vrot.slane %v2524_v0, %v2091_v41 }
 0x13d   :  { %719 = vrot.lane.b32.xlu0 %v702_v45, %s2002_s29  ;;  %v2547_v45 = vrot.slane %v1074_v9, %v2091_v41  ;;  %v1271_v9 = vcombine.high %v2205_v14, %v2205_v14 }
 0x13e   :  { %v1020_v55 = vrot.slane %v2537_v17, %v2093_v42 }
 0x13f   :  { %v1114_v62 = vrot.slane %v2547_v45, %v2093_v42  ;;  %v2606_v14 = vrot.slane %v1271_v9, %v2091_v41 }
 0x140   :  { %825 = vrot.lane.b32.xlu1 %v808_v51, %s2001_s28  ;;  %v2556_v51 = vrot.slane %v1059_v3, %v2091_v41  ;;  %v1377_v3 = vcombine.high %v2203_v13, %v2203_v13  ;;  %v1422_v13 = vcombine.high %v2237_v23, %v2237_v23  ;;  %v1498_v23 = vcombine.high %v2253_v28, %v2253_v28 }
 0x141   :  { %819 = vrot.lane.b32.xlu0 %v796_v56, %s2001_s28  ;;  %v1210_v56 = vcombine.high %v2223_v19, %v2223_v19  ;;  %v2617_v6 = vrot.slane %v2606_v14, %v2091_v41  ;;  %v1528_v28 = vcombine.high %v2276_v34, %v2276_v34  ;;  %v1634_v34 = vcombine.high %v2265_v32, %v2265_v32 }
 0x142   :  { %v2571_v10 = vrot.slane %v2556_v51, %v2091_v41  ;;  %v1710_v32 = vcombine.high %v2284_v36, %v2284_v36  ;;  %v1740_v36 = vcombine.high %v2322_v57, %v2322_v57  ;;  %v1846_v57 = vcombine.high %v2318_v47, %v2318_v47 }
 0x143   :  { %v1224_v19 = vrot.slane %v1210_v56, %v2093_v42  ;;  %v2620_v56 = vrot.slane %v1377_v3, %v2091_v41  ;;  %v2652_v3 = vrot.slane %v1483_v15, %v2091_v41 }
 0x144   :  { %925 = vrot.lane.b32.xlu1 %v902_v50, %s2004_s5  ;;  %v1126_v50 = vrot.slane %v2571_v10, %v2093_v42 }
 0x145   :  { %927 = vrot.lane.b32.xlu0 %v906_v58, %s2004_s5  ;;  %v1118_v58 = vrot.slane %v1104_v12, %v2093_v42  ;;  %v1232_v12 = vrot.slane %v2586_v61, %v2093_v42 }
 0x148   :  { %1033 = vrot.lane.b32.xlu1 %v1012_v48, %s2003_s30  ;;  %v1286_v48 = vcombine.high %v2215_v16, %v2215_v16 }
 0x149   :  { %931 = vrot.lane.b32.xlu0 %v914_v49, %s2004_s5  ;;  %v1316_v49 = vcombine.high %v2249_v27, %v2249_v27 }
 0x14a   :  { %v2603_v16 = vrot.slane %v1286_v48, %v2091_v41  ;;  %v2643_v48 = vrot.slane %v1498_v23, %v2091_v41  ;;  %v2684_v23 = vrot.slane %v1604_v21, %v2091_v41  ;;  %v1816_v21 = vcombine.high %v2280_v35, %v2280_v35 }
 0x14b   :  { %v1330_v27 = vrot.slane %v1316_v49, %v2093_v42 }
 0x14c   :  { %1037 = vrot.lane.b32.xlu1 %v1020_v55, %s2003_s30  ;;  %v1220_v55 = vrot.slane %v2580_v11, %v2093_v42 }
 0x14d   :  { %1031 = vrot.lane.b32.xlu0 %v1008_v4, %s2003_s30  ;;  %v1326_v4 = vrot.slane %v2603_v16, %v2093_v42 }
 0x150   :  { %1137 = vrot.lane.b32.xlu1 %v1114_v62, %s1998_s25  ;;  %v1436_v62 = vrot.slane %v1422_v13, %v2093_v42  ;;  %v2668_v13 = vrot.slane %v1589_v22, %v2091_v41 }
 0x151   :  { %1139 = vrot.lane.b32.xlu0 %v1118_v58, %s1998_s25  ;;  %v1338_v58 = vrot.slane %v2617_v6, %v2093_v42 }
 0x154   :  { %1245 = vrot.lane.b32.xlu1 %v1224_v19, %s1997_s24  ;;  %v2633_v19 = vrot.slane %v2620_v56, %v2091_v41 }
 0x155   :  { %1143 = vrot.lane.b32.xlu0 %v1126_v50, %s1998_s25  ;;  %v2636_v50 = vrot.slane %v1392_v20, %v2091_v41 }
 0x156   :  { %v1444_v9 = vrot.slane %v2633_v19, %v2093_v42 }
 0x157   :  { %v1432_v49 = vrot.slane %v2636_v50, %v2093_v42 }
 0x158   :  { %1249 = vrot.lane.b32.xlu1 %v1232_v12, %s1997_s24  ;;  %v1542_v12 = vrot.slane %v1528_v28, %v2093_v42  ;;  %v1644_v28 = vrot.slane %v2684_v23, %v2093_v42 }
 0x159   :  { %1243 = vrot.lane.b32.xlu0 %v1220_v55, %s1997_s24  ;;  %v1538_v55 = vrot.slane %v2643_v48, %v2093_v42 }
 0x15c   :  { %1349 = vrot.lane.b32.xlu1 %v1326_v4, %s2000_s27  ;;  %v1648_v4 = vrot.slane %v1634_v34, %v2093_v42 }
 0x15d   :  { %1351 = vrot.lane.b32.xlu0 %v1330_v27, %s2000_s27  ;;  %v2665_v27 = vrot.slane %v2652_v3, %v2091_v41 }
 0x15f   :  { %v1550_v20 = vrot.slane %v2665_v27, %v2093_v42 }
 0x160   :  { %1457 = vrot.lane.b32.xlu1 %v1436_v62, %s1999_s26  ;;  %v2681_v62 = vrot.slane %v2668_v13, %v2091_v41 }
 0x161   :  { %1355 = vrot.lane.b32.xlu0 %v1338_v58, %s2000_s27  ;;  %v2691_v58 = vrot.slane %v1710_v32, %v2091_v41 }
 0x162   :  { %v1656_v15 = vrot.slane %v2681_v62, %v2093_v42 }
 0x163   :  { %v1750_v34 = vrot.slane %v2691_v58, %v2093_v42 }
 0x164   :  { %1461 = vrot.lane.b32.xlu1 %v1444_v9, %s1999_s26  ;;  %v2700_v9 = vrot.slane %v1695_v24, %v2091_v41  ;;  %v2740_v24 = vrot.slane %v1816_v21, %v2091_v41 }
 0x165   :  { %1455 = vrot.lane.b32.xlu0 %v1432_v49, %s1999_s26  ;;  %v1754_v49 = vrot.slane %v1740_v36, %v2093_v42  ;;  %v257_v36 = vcombine.high %v2351_v7, %v2351_v7  ;;  %v56_v7 = vstv %s55_s7 }
 0x166   :  { %1919 = vst.msk [vmem:[%s3451_s4 + $0x48] sm:$0xff] %vm35_vm11, %v56_v7  ;;  %1920 = vst.msk [vmem:[%s3451_s4 + $0x50] sm:$0xff] %vm35_vm11, %v56_v7 }
 0x167   :  { %1921 = vst.msk [vmem:[%s3451_s4 + $0x58] sm:$0xf] %vm38_vm12, %v56_v7  ;;  %v273_v21 = vrot.slane %v257_v36, %v2093_v42 }
 0x168   :  { %1561 = vrot.lane.b32.xlu1 %v1538_v55, %s2002_s29  ;;  %v2713_v55 = vrot.slane %v2700_v9, %v2091_v41 }
 0x169   :  { %1563 = vrot.lane.b32.xlu0 %v1542_v12, %s2002_s29 }
 0x16a   :  { %v1762_v32 = vrot.slane %v2713_v55, %v2093_v42 }
 0x16c   :  { %1669 = vrot.lane.b32.xlu1 %v1648_v4, %s2001_s28  ;;  %v1860_v4 = vrot.slane %v1846_v57, %v2093_v42  ;;  %v1856_v57 = vrot.slane %v2740_v24, %v2093_v42 }
 0x16d   :  { %1567 = vrot.lane.b32.xlu0 %v1550_v20, %s2002_s29  ;;  %v2737_v20 = vrot.slane %v2716_v29, %v2091_v41 }
 0x170   :  { %1673 = vrot.lane.b32.xlu1 %v1656_v15, %s2001_s28  ;;  %v256_v15 = vcombine.high %v2382_v33, %v2382_v33  ;;  %v364_v33 = vcombine.high %v2394_v39, %v2394_v39  ;;  %v70_v39 = vstv %s69_s1 }
 0x171   :  { %1667 = vrot.lane.b32.xlu0 %v1644_v28, %s2001_s28  ;;  %1927 = vst.msk [vmem:[%s3451_s4 + $0x78] sm:$0xff] %vm35_vm11, %v70_v39  ;;  %1928 = vst.msk [vmem:[%s3451_s4 + $0x80] sm:$0xff] %vm35_vm11, %v70_v39 }
 0x172   :  { %v394_v22 = vpop.permute.xlu1 %393  ;;  %1929 = vst.msk [vmem:[%s3451_s4 + $0x88] sm:$0xf] %vm38_vm12, %v70_v39  ;;  %v380_v36 = vrot.slane %v364_v33, %v2093_v42  ;;  %v439_v33 = vcombine.high %v2412_v52, %v2412_v52 }
 0x173   :  { %v287_v12 = vpop.permute.xlu0 %286  ;;  %414 = vst.msk [vmem:[%s3451_s4 + $0x3] sm:$0x1] %vm307_vm13, %v394_v22  ;;  %v226_v22 = vcombine.high %v2354_v8, %v2354_v8  ;;  %v77_v8 = vstv %s76_s9 }
 0x174   :  { %308 = vst.msk [vmem:[%s3451_s4 + $0x2] sm:$0x1] %vm307_vm13, %v287_v12  ;;  %1773 = vrot.lane.b32.xlu1 %v1750_v34, %s2004_s5 }
 0x175   :  { %1775 = vrot.lane.b32.xlu0 %v1754_v49, %s2004_s5  ;;  %v1868_v49 = vrot.slane %v2737_v20, %v2093_v42  ;;  %1931 = vst.msk [vmem:[%s3451_s4 + $0x90] sm:$0xff] %vm35_vm11, %v77_v8  ;;  %1932 = vst.msk [vmem:[%s3451_s4 + $0x98] sm:$0xff] %vm35_vm11, %v77_v8 }
 0x176   :  { %v606_v47 = vpop.permute.xlu1 %605  ;;  %1933 = vst.msk [vmem:[%s3451_s4 + $0xa0] sm:$0xf] %vm38_vm12, %v77_v8  ;;  %v470_v8 = vcombine.high %v2409_v43, %v2409_v43  ;;  %v576_v43 = vcombine.high %v2444_v46, %v2444_v46 }
 0x177   :  { %v500_v35 = vpop.permute.xlu0 %499  ;;  %626 = vst.msk [vmem:[%s3451_s4 + $0x5] sm:$0x1] %vm307_vm13, %v606_v47  ;;  %v285_v47 = vrot.slane %v256_v15, %v2093_v42 }
 0x178   :  { %520 = vst.msk [vmem:[%s3451_s4 + $0x4] sm:$0x1] %vm307_vm13, %v500_v35  ;;  %1881 = vrot.lane.b32.xlu1 %v1860_v4, %s2003_s30  ;;  %v254_v35 = vrot.slane %v226_v22, %v2091_v41  ;;  %v333_v4 = vcombine.high %v2361_v25, %v2361_v25 }
 0x179   :  { %1779 = vrot.lane.b32.xlu0 %v1762_v32, %s2004_s5 }
 0x17a   :  { %v818_v28 = vpop.permute.xlu1 %817  ;;  %v281_v15 = vrot.slane %v254_v35, %v2093_v42 }
 0x17b   :  { %v712_v30 = vpop.permute.xlu0 %711  ;;  %838 = vst.msk [vmem:[%s3451_s4 + $0x7] sm:$0x1] %vm307_vm13, %v818_v28  ;;  %v361_v28 = vrot.slane %v333_v4, %v2091_v41  ;;  %v592_v4 = vrot.slane %v576_v43, %v2093_v42 }
 0x17c   :  { %732 = vst.msk [vmem:[%s3451_s4 + $0x6] sm:$0x1] %vm307_vm13, %v712_v30  ;;  %1885 = vrot.lane.b32.xlu1 %v1868_v49, %s2003_s30  ;;  %v363_v30 = vcombine.high %v2389_v38, %v2389_v38  ;;  %v469_v49 = vcombine.high %v2425_v18, %v2425_v18 }
 0x17d   :  { %1879 = vrot.lane.b32.xlu0 %v1856_v57, %s2003_s30  ;;  %v388_v38 = vrot.slane %v361_v28, %v2093_v42 }
 0x17e   :  { %v1030_v12 = vpop.permute.xlu1 %1029  ;;  %v392_v7 = vrot.slane %v363_v30, %v2093_v42  ;;  %v498_v52 = vrot.slane %v469_v49, %v2093_v42  ;;  %v682_v30 = vcombine.high %v2451_v40, %v2451_v40  ;;  %v651_v49 = vcombine.high %v2460_v1, %v2460_v1 }
 0x17f   :  { %v924_v34 = vpop.permute.xlu0 %923  ;;  %1050 = vst.msk [vmem:[%s3451_s4 + $0x9] sm:$0x1] %vm307_vm13, %v1030_v12  ;;  %v788_v40 = vcombine.high %v2492_v59, %v2492_v59 }
 0x180   :  { %944 = vst.msk [vmem:[%s3451_s4 + $0x8] sm:$0x1] %vm307_vm13, %v924_v34  ;;  %292 = vrot.lane.b32.xlu1 %v273_v21, %s1998_s25  ;;  %v486_v34 = vrot.slane %v470_v8, %v2093_v42  ;;  %v467_v21 = vrot.slane %v439_v33, %v2091_v41 }
 0x181   :  { %298 = vrot.lane.b32.xlu0 %v285_v47, %s1998_s25  ;;  %v545_v47 = vcombine.high %v2428_v53, %v2428_v53  ;;  %v804_v33 = vrot.slane %v788_v40, %v2093_v42  ;;  %v1106_v40 = vcombine.high %v2547_v45, %v2547_v45  ;;  %v1212_v45 = vcombine.high %v2580_v11, %v2580_v11 }
 0x182   :  { %v1242_v25 = vpop.permute.xlu1 %1241  ;;  %v494_v53 = vrot.slane %v467_v21, %v2093_v42 }
 0x183   :  { %v1136_v32 = vpop.permute.xlu0 %1135  ;;  %1262 = vst.msk [vmem:[%s3451_s4 + $0xb] sm:$0x1] %vm307_vm13, %v1242_v25  ;;  %v573_v39 = vrot.slane %v545_v47, %v2091_v41  ;;  %v575_v25 = vcombine.high %v2441_v37, %v2441_v37  ;;  %v894_v47 = vcombine.high %v2499_v31, %v2499_v31  ;;  %v1000_v31 = vcombine.high %v2540_v63, %v2540_v63 }
 0x184   :  { %1156 = vst.msk [vmem:[%s3451_s4 + $0xa] sm:$0x1] %vm307_vm13, %v1136_v32  ;;  %296 = vrot.lane.b32.xlu1 %v281_v15, %s1998_s25  ;;  %v681_v32 = vcombine.high %v2473_v54, %v2473_v54 }
 0x185   :  { %399 = vrot.lane.b32.xlu0 %v380_v36, %s1997_s24  ;;  %v600_v37 = vrot.slane %v573_v39, %v2093_v42  ;;  %v604_v28 = vrot.slane %v575_v25, %v2093_v42  ;;  %v969_v39 = vcombine.high %v2524_v0, %v2524_v0 }
 0x186   :  { %v1454_v57 = vpop.permute.xlu1 %1453  ;;  %v710_v1 = vrot.slane %v681_v32, %v2093_v42  ;;  %v1016_v32 = vrot.slane %v1000_v31, %v2093_v42 }
 0x187   :  { %v1348_v22 = vpop.permute.xlu0 %1347  ;;  %1474 = vst.msk [vmem:[%s3451_s4 + $0xd] sm:$0x1] %vm307_vm13, %v1454_v57 }
 0x188   :  { %1368 = vst.msk [vmem:[%s3451_s4 + $0xc] sm:$0x1] %vm307_vm13, %v1348_v22  ;;  %405 = vrot.lane.b32.xlu1 %v392_v7, %s1997_s24  ;;  %v698_v22 = vrot.slane %v682_v30, %v2093_v42  ;;  %v757_v7 = vcombine.high %v2476_v60, %v2476_v60 }
 0x189   :  { %403 = vrot.lane.b32.xlu0 %v388_v38, %s1997_s24  ;;  %v679_v38 = vrot.slane %v651_v49, %v2091_v41 }
 0x18a   :  { %v1666_v18 = vpop.permute.xlu1 %1665  ;;  %v785_v43 = vrot.slane %v757_v7, %v2091_v41 }
 0x18b   :  { %v1560_v12 = vpop.permute.xlu0 %1559  ;;  %1686 = vst.msk [vmem:[%s3451_s4 + $0xf] sm:$0x1] %vm307_vm13, %v1666_v18  ;;  %v706_v60 = vrot.slane %v679_v38, %v2093_v42  ;;  %v787_v18 = vcombine.high %v2489_v26, %v2489_v26  ;;  %v1181_v38 = vcombine.high %v2574_v5, %v2574_v5 }
 0x18c   :  { %1580 = vst.msk [vmem:[%s3451_s4 + $0xe] sm:$0x1] %vm307_vm13, %v1560_v12  ;;  %505 = vrot.lane.b32.xlu1 %v486_v34, %s2000_s27  ;;  %v893_v12 = vcombine.high %v2521_v2, %v2521_v2  ;;  %v812_v26 = vrot.slane %v785_v43, %v2093_v42 }
 0x18d   :  { %511 = vrot.lane.b32.xlu0 %v498_v52, %s2000_s27  ;;  %v816_v21 = vrot.slane %v787_v18, %v2093_v42 }
 0x18e   :  { %v1878_v46 = vpop.permute.xlu1 %1877 }
 0x18f   :  { %v1772_v35 = vpop.permute.xlu0 %1771  ;;  %1898 = vst.msk [vmem:[%s3451_s4 + $0x11] sm:$0x1] %vm307_vm13, %v1878_v46  ;;  %v863_v46 = vcombine.high %v2508_v44, %v2508_v44  ;;  %v922_v44 = vrot.slane %v893_v12, %v2093_v42 }
 0x190   :  { %1792 = vst.msk [vmem:[%s3451_s4 + $0x10] sm:$0x1] %vm307_vm13, %v1772_v35  ;;  %509 = vrot.lane.b32.xlu1 %v494_v53, %s2000_s27 }
 0x191   :  { %611 = vrot.lane.b32.xlu0 %v592_v4, %s1999_s26  ;;  %v910_v4 = vrot.slane %v894_v47, %v2093_v42  ;;  %v891_v53 = vrot.slane %v863_v46, %v2091_v41  ;;  %v1424_v47 = vcombine.high %v2636_v50, %v2636_v50 }
 0x192   :  { %v291_v36 = vpop.permute.xlu1 %290 }
 0x193   :  { %v289_v15 = vpop.permute.xlu0 %288  ;;  %310 = vst.msk [vmem:[%s3451_s4 + $0x32] sm:$0x1] %vm307_vm13, %v291_v36  ;;  %v918_v0 = vrot.slane %v891_v53, %v2093_v42  ;;  %v997_v36 = vrot.slane %v969_v39, %v2091_v41  ;;  %v1529_v53 = vcombine.high %v2665_v27, %v2665_v27 }
 0x194   :  { %309 = vst.msk [vmem:[%s3451_s4 + $0x1a] sm:$0x1] %vm307_vm13, %v289_v15  ;;  %617 = vrot.lane.b32.xlu1 %v604_v28, %s1999_s26  ;;  %v999_v15 = vcombine.high %v2537_v17, %v2537_v17 }
 0x195   :  { %615 = vrot.lane.b32.xlu0 %v600_v37, %s1999_s26  ;;  %v1105_v37 = vcombine.high %v2571_v10, %v2571_v10  ;;  %v1024_v17 = vrot.slane %v997_v36, %v2093_v42  ;;  %v1558_v36 = vrot.slane %v1529_v53, %v2093_v42 }
 0x196   :  { %v398_v54 = vpop.permute.xlu1 %397  ;;  %v1028_v49 = vrot.slane %v999_v15, %v2093_v42 }
 0x197   :  { %v295_v57 = vpop.permute.xlu0 %294  ;;  %416 = vst.msk [vmem:[%s3451_s4 + $0x33] sm:$0x1] %vm307_vm13, %v398_v54  ;;  %v1075_v54 = vcombine.high %v2556_v51, %v2556_v51  ;;  %v1134_v51 = vrot.slane %v1105_v37, %v2093_v42 }
 0x198   :  { %312 = vst.msk [vmem:[%s3451_s4 + $0x62] sm:$0x1] %vm307_vm13, %v295_v57  ;;  %717 = vrot.lane.b32.xlu1 %v698_v22, %s2002_s29 }
 0x199   :  { %723 = vrot.lane.b32.xlu0 %v710_v1, %s2002_s29  ;;  %v1122_v1 = vrot.slane %v1106_v40, %v2093_v42  ;;  %v1103_v22 = vrot.slane %v1075_v54, %v2091_v41  ;;  %v1711_v40 = vcombine.high %v2700_v9, %v2700_v9  ;;  %v1741_v54 = vcombine.high %v2713_v55, %v2713_v55 }
 0x19a   :  { %v402_v59 = vpop.permute.xlu1 %401  ;;  %v1848_v9 = vcombine.high %v2740_v24, %v2740_v24 }
 0x19b   :  { %v396_v8 = vpop.permute.xlu0 %395  ;;  %418 = vst.msk [vmem:[%s3451_s4 + $0x63] sm:$0x1] %vm307_vm13, %v402_v59  ;;  %v1228_v59 = vrot.slane %v1212_v45, %v2093_v42  ;;  %v1130_v5 = vrot.slane %v1103_v22, %v2093_v42  ;;  %v1770_v22 = vrot.slane %v1741_v54, %v2093_v42 }
 0x19c   :  { %415 = vst.msk [vmem:[%s3451_s4 + $0x1b] sm:$0x1] %vm307_vm13, %v396_v8  ;;  %721 = vrot.lane.b32.xlu1 %v706_v60, %s2002_s29  ;;  %v1209_v8 = vrot.slane %v1181_v38, %v2091_v41  ;;  %v1317_v60 = vcombine.high %v2617_v6, %v2617_v6 }
 0x19d   :  { %823 = vrot.lane.b32.xlu0 %v804_v33, %s2001_s28  ;;  %v1211_v33 = vcombine.high %v2586_v61, %v2586_v61 }
 0x19e   :  { %v502_v52 = vpop.permute.xlu1 %501  ;;  %v1236_v61 = vrot.slane %v1209_v8, %v2093_v42 }
 0x19f   :  { %v504_v34 = vpop.permute.xlu0 %503  ;;  %521 = vst.msk [vmem:[%s3451_s4 + $0x1c] sm:$0x1] %vm307_vm13, %v502_v52  ;;  %v1240_v12 = vrot.slane %v1211_v33, %v2093_v42  ;;  %v1318_v52 = vcombine.high %v2603_v16, %v2603_v16  ;;  %v1393_v16 = vcombine.high %v2620_v56, %v2620_v56  ;;  %v1423_v56 = vcombine.high %v2633_v19, %v2633_v19 }
 0x1a0   :  { %522 = vst.msk [vmem:[%s3451_s4 + $0x34] sm:$0x1] %vm307_vm13, %v504_v34  ;;  %829 = vrot.lane.b32.xlu1 %v816_v21, %s2001_s28  ;;  %v1287_v34 = vcombine.high %v2606_v14, %v2606_v14  ;;  %v1346_v14 = vrot.slane %v1317_v60, %v2093_v42  ;;  %v1530_v19 = vcombine.high %v2643_v48, %v2643_v48 }
 0x1a1   :  { %827 = vrot.lane.b32.xlu0 %v812_v26, %s2001_s28  ;;  %v1334_v21 = vrot.slane %v1318_v52, %v2093_v42  ;;  %v1605_v48 = vcombine.high %v2668_v13, %v2668_v13  ;;  %v1635_v13 = vcombine.high %v2681_v62, %v2681_v62  ;;  %v1742_v62 = vcombine.high %v2691_v58, %v2691_v58 }
 0x1a2   :  { %v610_v2 = vpop.permute.xlu1 %609  ;;  %v1315_v46 = vrot.slane %v1287_v34, %v2091_v41  ;;  %v1546_v15 = vrot.slane %v1530_v19, %v2093_v42  ;;  %v1817_v58 = vcombine.high %v2716_v29, %v2716_v29  ;;  %v1847_v29 = vcombine.high %v2737_v20, %v2737_v20 }
 0x1a3   :  { %v508_v35 = vpop.permute.xlu0 %507  ;;  %628 = vst.msk [vmem:[%s3451_s4 + $0x35] sm:$0x1] %vm307_vm13, %v610_v2  ;;  %v1440_v2 = vrot.slane %v1424_v47, %v2093_v42  ;;  %v1758_v38 = vrot.slane %v1742_v62, %v2093_v42 }
 0x1a4   :  { %524 = vst.msk [vmem:[%s3451_s4 + $0x64] sm:$0x1] %vm307_vm13, %v508_v35  ;;  %929 = vrot.lane.b32.xlu1 %v910_v4, %s2004_s5  ;;  %v1342_v35 = vrot.slane %v1315_v46, %v2093_v42  ;;  %v1499_v4 = vcombine.high %v2652_v3, %v2652_v3  ;;  %v1636_v3 = vcombine.high %v2684_v23, %v2684_v23 }
 0x1a5   :  { %935 = vrot.lane.b32.xlu0 %v922_v44, %s2004_s5  ;;  %v1421_v44 = vrot.slane %v1393_v16, %v2091_v41  ;;  %v1845_v8 = vrot.slane %v1817_v58, %v2091_v41 }
 0x1a6   :  { %v614_v63 = vpop.permute.xlu1 %613  ;;  %v1527_v37 = vrot.slane %v1499_v4, %v2091_v41 }
 0x1a7   :  { %v608_v25 = vpop.permute.xlu0 %607  ;;  %630 = vst.msk [vmem:[%s3451_s4 + $0x65] sm:$0x1] %vm307_vm13, %v614_v63  ;;  %v1872_v60 = vrot.slane %v1845_v8, %v2093_v42 }
 0x1a8   :  { %627 = vst.msk [vmem:[%s3451_s4 + $0x1d] sm:$0x1] %vm307_vm13, %v608_v25  ;;  %933 = vrot.lane.b32.xlu1 %v918_v0, %s2004_s5  ;;  %v1448_v25 = vrot.slane %v1421_v44, %v2093_v42 }
 0x1a9   :  { %1035 = vrot.lane.b32.xlu0 %v1016_v32, %s2003_s30  ;;  %v1452_v32 = vrot.slane %v1423_v56, %v2093_v42 }
 0x1aa   :  { %v714_v28 = vpop.permute.xlu1 %713 }
 0x1ab   :  { %v716_v30 = vpop.permute.xlu0 %715  ;;  %733 = vst.msk [vmem:[%s3451_s4 + $0x1e] sm:$0x1] %vm307_vm13, %v714_v28 }
 0x1ac   :  { %734 = vst.msk [vmem:[%s3451_s4 + $0x36] sm:$0x1] %vm307_vm13, %v716_v30  ;;  %1041 = vrot.lane.b32.xlu1 %v1028_v49, %s2003_s30  ;;  %v1652_v30 = vrot.slane %v1636_v3, %v2093_v42  ;;  %v1633_v49 = vrot.slane %v1605_v48, %v2091_v41 }
 0x1ad   :  { %1039 = vrot.lane.b32.xlu0 %v1024_v17, %s2003_s30  ;;  %v1554_v17 = vrot.slane %v1527_v37, %v2093_v42 }
 0x1ae   :  { %v822_v10 = vpop.permute.xlu1 %821 }
 0x1af   :  { %v720_v57 = vpop.permute.xlu0 %719  ;;  %840 = vst.msk [vmem:[%s3451_s4 + $0x37] sm:$0x1] %vm307_vm13, %v822_v10 }
 0x1b0   :  { %736 = vst.msk [vmem:[%s3451_s4 + $0x66] sm:$0x1] %vm307_vm13, %v720_v57  ;;  %1141 = vrot.lane.b32.xlu1 %v1122_v1, %s1998_s25  ;;  %v1660_v57 = vrot.slane %v1633_v49, %v2093_v42 }
 0x1b1   :  { %1147 = vrot.lane.b32.xlu0 %v1134_v51, %s1998_s25  ;;  %v1664_v51 = vrot.slane %v1635_v13, %v2093_v42 }
 0x1b2   :  { %v826_v11 = vpop.permute.xlu1 %825 }
 0x1b3   :  { %v820_v7 = vpop.permute.xlu0 %819  ;;  %842 = vst.msk [vmem:[%s3451_s4 + $0x67] sm:$0x1] %vm307_vm13, %v826_v11  ;;  %v1739_v11 = vrot.slane %v1711_v40, %v2091_v41  ;;  %v1876_v41 = vrot.slane %v1847_v29, %v2093_v42 }
 0x1b4   :  { %839 = vst.msk [vmem:[%s3451_s4 + $0x1f] sm:$0x1] %vm307_vm13, %v820_v7  ;;  %1145 = vrot.lane.b32.xlu1 %v1130_v5, %s1998_s25 }
 0x1b5   :  { %1247 = vrot.lane.b32.xlu0 %v1228_v59, %s1997_s24  ;;  %v1864_v59 = vrot.slane %v1848_v9, %v2093_v42  ;;  %v1766_v5 = vrot.slane %v1739_v11, %v2093_v42 }
 0x1b6   :  { %v926_v43 = vpop.permute.xlu1 %925 }
 0x1b7   :  { %v928_v18 = vpop.permute.xlu0 %927  ;;  %945 = vst.msk [vmem:[%s3451_s4 + $0x20] sm:$0x1] %vm307_vm13, %v926_v43 }
 0x1b8   :  { %946 = vst.msk [vmem:[%s3451_s4 + $0x38] sm:$0x1] %vm307_vm13, %v928_v18  ;;  %1253 = vrot.lane.b32.xlu1 %v1240_v12, %s1997_s24 }
 0x1b9   :  { %1251 = vrot.lane.b32.xlu0 %v1236_v61, %s1997_s24 }
 0x1ba   :  { %v1034_v6 = vpop.permute.xlu1 %1033 }
 0x1bb   :  { %v932_v26 = vpop.permute.xlu0 %931  ;;  %1052 = vst.msk [vmem:[%s3451_s4 + $0x39] sm:$0x1] %vm307_vm13, %v1034_v6 }
 0x1bc   :  { %948 = vst.msk [vmem:[%s3451_s4 + $0x68] sm:$0x1] %vm307_vm13, %v932_v26  ;;  %1353 = vrot.lane.b32.xlu1 %v1334_v21, %s2000_s27 }
 0x1bd   :  { %1359 = vrot.lane.b32.xlu0 %v1346_v14, %s2000_s27 }
 0x1be   :  { %v1038_v50 = vpop.permute.xlu1 %1037 }
 0x1bf   :  { %v1032_v31 = vpop.permute.xlu0 %1031  ;;  %1054 = vst.msk [vmem:[%s3451_s4 + $0x69] sm:$0x1] %vm307_vm13, %v1038_v50 }
 0x1c0   :  { %1051 = vst.msk [vmem:[%s3451_s4 + $0x21] sm:$0x1] %vm307_vm13, %v1032_v31  ;;  %1357 = vrot.lane.b32.xlu1 %v1342_v35, %s2000_s27 }
 0x1c1   :  { %1459 = vrot.lane.b32.xlu0 %v1440_v2, %s1999_s26 }
 0x1c2   :  { %v1138_v39 = vpop.permute.xlu1 %1137 }
 0x1c3   :  { %v1140_v63 = vpop.permute.xlu0 %1139  ;;  %1157 = vst.msk [vmem:[%s3451_s4 + $0x22] sm:$0x1] %vm307_vm13, %v1138_v39 }
 0x1c4   :  { %1158 = vst.msk [vmem:[%s3451_s4 + $0x3a] sm:$0x1] %vm307_vm13, %v1140_v63  ;;  %1465 = vrot.lane.b32.xlu1 %v1452_v32, %s1999_s26 }
 0x1c5   :  { %1463 = vrot.lane.b32.xlu0 %v1448_v25, %s1999_s26 }
 0x1c6   :  { %v1246_v27 = vpop.permute.xlu1 %1245 }
 0x1c7   :  { %v1144_v0 = vpop.permute.xlu0 %1143  ;;  %1264 = vst.msk [vmem:[%s3451_s4 + $0x3b] sm:$0x1] %vm307_vm13, %v1246_v27 }
 0x1c8   :  { %1160 = vst.msk [vmem:[%s3451_s4 + $0x6a] sm:$0x1] %vm307_vm13, %v1144_v0  ;;  %1565 = vrot.lane.b32.xlu1 %v1546_v15, %s2002_s29 }
 0x1c9   :  { %1571 = vrot.lane.b32.xlu0 %v1558_v36, %s2002_s29 }
 0x1ca   :  { %v1250_v23 = vpop.permute.xlu1 %1249 }
 0x1cb   :  { %v1244_v28 = vpop.permute.xlu0 %1243  ;;  %1266 = vst.msk [vmem:[%s3451_s4 + $0x6b] sm:$0x1] %vm307_vm13, %v1250_v23 }
 0x1cc   :  { %1263 = vst.msk [vmem:[%s3451_s4 + $0x23] sm:$0x1] %vm307_vm13, %v1244_v28  ;;  %1569 = vrot.lane.b32.xlu1 %v1554_v17, %s2002_s29 }
 0x1cd   :  { %1671 = vrot.lane.b32.xlu0 %v1652_v30, %s2001_s28 }
 0x1ce   :  { %v1350_v45 = vpop.permute.xlu1 %1349 }
 0x1cf   :  { %v1352_v10 = vpop.permute.xlu0 %1351  ;;  %1369 = vst.msk [vmem:[%s3451_s4 + $0x24] sm:$0x1] %vm307_vm13, %v1350_v45 }
 0x1d0   :  { %1370 = vst.msk [vmem:[%s3451_s4 + $0x3c] sm:$0x1] %vm307_vm13, %v1352_v10  ;;  %1677 = vrot.lane.b32.xlu1 %v1664_v51, %s2001_s28 }
 0x1d1   :  { %1675 = vrot.lane.b32.xlu0 %v1660_v57, %s2001_s28 }
 0x1d2   :  { %v1458_v55 = vpop.permute.xlu1 %1457 }
 0x1d3   :  { %v1356_v1 = vpop.permute.xlu0 %1355  ;;  %1476 = vst.msk [vmem:[%s3451_s4 + $0x3d] sm:$0x1] %vm307_vm13, %v1458_v55 }
 0x1d4   :  { %1372 = vst.msk [vmem:[%s3451_s4 + $0x6c] sm:$0x1] %vm307_vm13, %v1356_v1  ;;  %1777 = vrot.lane.b32.xlu1 %v1758_v38, %s2004_s5 }
 0x1d5   :  { %1783 = vrot.lane.b32.xlu0 %v1770_v22, %s2004_s5 }
 0x1d6   :  { %v1462_v24 = vpop.permute.xlu1 %1461 }
 0x1d7   :  { %v1456_v7 = vpop.permute.xlu0 %1455  ;;  %1478 = vst.msk [vmem:[%s3451_s4 + $0x6d] sm:$0x1] %vm307_vm13, %v1462_v24 }
 0x1d8   :  { %1475 = vst.msk [vmem:[%s3451_s4 + $0x25] sm:$0x1] %vm307_vm13, %v1456_v7  ;;  %1781 = vrot.lane.b32.xlu1 %v1766_v5, %s2004_s5 }
 0x1d9   :  { %1883 = vrot.lane.b32.xlu0 %v1864_v59, %s2003_s30 }
 0x1da   :  { %v1562_v20 = vpop.permute.xlu1 %1561 }
 0x1db   :  { %v1564_v33 = vpop.permute.xlu0 %1563  ;;  %1581 = vst.msk [vmem:[%s3451_s4 + $0x26] sm:$0x1] %vm307_vm13, %v1562_v20 }
 0x1dc   :  { %1582 = vst.msk [vmem:[%s3451_s4 + $0x3e] sm:$0x1] %vm307_vm13, %v1564_v33  ;;  %1889 = vrot.lane.b32.xlu1 %v1876_v41, %s2003_s30 }
 0x1dd   :  { %1887 = vrot.lane.b32.xlu0 %v1872_v60, %s2003_s30 }
 0x1de   :  { %v1670_v43 = vpop.permute.xlu1 %1669 }
 0x1df   :  { %v1568_v18 = vpop.permute.xlu0 %1567  ;;  %1688 = vst.msk [vmem:[%s3451_s4 + $0x3f] sm:$0x1] %vm307_vm13, %v1670_v43 }
 0x1e0   :  { %1584 = vst.msk [vmem:[%s3451_s4 + $0x6e] sm:$0x1] %vm307_vm13, %v1568_v18 }
 0x1e2   :  { %v1674_v42 = vpop.permute.xlu1 %1673 }
 0x1e3   :  { %v1668_v61 = vpop.permute.xlu0 %1667  ;;  %1690 = vst.msk [vmem:[%s3451_s4 + $0x6f] sm:$0x1] %vm307_vm13, %v1674_v42 }
 0x1e4   :  { %1687 = vst.msk [vmem:[%s3451_s4 + $0x27] sm:$0x1] %vm307_vm13, %v1668_v61 }
 0x1e6   :  { %v1774_v12 = vpop.permute.xlu1 %1773 }
 0x1e7   :  { %v1776_v52 = vpop.permute.xlu0 %1775  ;;  %1793 = vst.msk [vmem:[%s3451_s4 + $0x28] sm:$0x1] %vm307_vm13, %v1774_v12 }
 0x1e8   :  { %1794 = vst.msk [vmem:[%s3451_s4 + $0x40] sm:$0x1] %vm307_vm13, %v1776_v52 }
 0x1ea   :  { %v1882_v34 = vpop.permute.xlu1 %1881 }
 0x1eb   :  { %v1780_v16 = vpop.permute.xlu0 %1779  ;;  %1900 = vst.msk [vmem:[%s3451_s4 + $0x41] sm:$0x1] %vm307_vm13, %v1882_v34 }
 0x1ec   :  { %1796 = vst.msk [vmem:[%s3451_s4 + $0x70] sm:$0x1] %vm307_vm13, %v1780_v16 }
 0x1ee   :  { %v1886_v6 = vpop.permute.xlu1 %1885 }
 0x1ef   :  { %v1880_v26 = vpop.permute.xlu0 %1879  ;;  %1902 = vst.msk [vmem:[%s3451_s4 + $0x71] sm:$0x1] %vm307_vm13, %v1886_v6 }
 0x1f0   :  { %1899 = vst.msk [vmem:[%s3451_s4 + $0x29] sm:$0x1] %vm307_vm13, %v1880_v26 }
 0x1f2   :  { %v293_v14 = vpop.permute.xlu1 %292 }
 0x1f3   :  { %v299_v21 = vpop.permute.xlu0 %298  ;;  %311 = vst.msk [vmem:[%s3451_s4 + $0x4a] sm:$0x1] %vm307_vm13, %v293_v14 }
 0x1f4   :  { %314 = vst.msk [vmem:[%s3451_s4 + $0x92] sm:$0x1] %vm307_vm13, %v299_v21 }
 0x1f6   :  { %v297_v46 = vpop.permute.xlu1 %296 }
 0x1f7   :  { %v400_v47 = vpop.permute.xlu0 %399  ;;  %313 = vst.msk [vmem:[%s3451_s4 + $0x7a] sm:$0x1] %vm307_vm13, %v297_v46 }
 0x1f8   :  { %417 = vst.msk [vmem:[%s3451_s4 + $0x4b] sm:$0x1] %vm307_vm13, %v400_v47 }
 0x1fa   :  { %v406_v50 = vpop.permute.xlu1 %405 }
 0x1fb   :  { %v404_v56 = vpop.permute.xlu0 %403  ;;  %420 = vst.msk [vmem:[%s3451_s4 + $0x93] sm:$0x1] %vm307_vm13, %v406_v50 }
 0x1fc   :  { %419 = vst.msk [vmem:[%s3451_s4 + $0x7b] sm:$0x1] %vm307_vm13, %v404_v56 }
 0x1fe   :  { %v506_v2 = vpop.permute.xlu1 %505 }
 0x1ff   :  { %v512_v31 = vpop.permute.xlu0 %511  ;;  %523 = vst.msk [vmem:[%s3451_s4 + $0x4c] sm:$0x1] %vm307_vm13, %v506_v2 }
 0x200   :  { %526 = vst.msk [vmem:[%s3451_s4 + $0x94] sm:$0x1] %vm307_vm13, %v512_v31 }
 0x202   :  { %v510_v44 = vpop.permute.xlu1 %509 }
 0x203   :  { %v612_v35 = vpop.permute.xlu0 %611  ;;  %525 = vst.msk [vmem:[%s3451_s4 + $0x7c] sm:$0x1] %vm307_vm13, %v510_v44 }
 0x204   :  { %629 = vst.msk [vmem:[%s3451_s4 + $0x4d] sm:$0x1] %vm307_vm13, %v612_v35 }
 0x206   :  { %v618_v4 = vpop.permute.xlu1 %617 }
 0x207   :  { %v616_v19 = vpop.permute.xlu0 %615  ;;  %632 = vst.msk [vmem:[%s3451_s4 + $0x95] sm:$0x1] %vm307_vm13, %v618_v4 }
 0x208   :  { %631 = vst.msk [vmem:[%s3451_s4 + $0x7d] sm:$0x1] %vm307_vm13, %v616_v19 }
 0x20a   :  { %v718_v39 = vpop.permute.xlu1 %717 }
 0x20b   :  { %v724_v53 = vpop.permute.xlu0 %723  ;;  %735 = vst.msk [vmem:[%s3451_s4 + $0x4e] sm:$0x1] %vm307_vm13, %v718_v39 }
 0x20c   :  { %738 = vst.msk [vmem:[%s3451_s4 + $0x96] sm:$0x1] %vm307_vm13, %v724_v53 }
 0x20e   :  { %v722_v25 = vpop.permute.xlu1 %721 }
 0x20f   :  { %v824_v63 = vpop.permute.xlu0 %823  ;;  %737 = vst.msk [vmem:[%s3451_s4 + $0x7e] sm:$0x1] %vm307_vm13, %v722_v25 }
 0x210   :  { %841 = vst.msk [vmem:[%s3451_s4 + $0x4f] sm:$0x1] %vm307_vm13, %v824_v63 }
 0x212   :  { %v830_v48 = vpop.permute.xlu1 %829 }
 0x213   :  { %v828_v32 = vpop.permute.xlu0 %827  ;;  %844 = vst.msk [vmem:[%s3451_s4 + $0x97] sm:$0x1] %vm307_vm13, %v830_v48 }
 0x214   :  { %843 = vst.msk [vmem:[%s3451_s4 + $0x7f] sm:$0x1] %vm307_vm13, %v828_v32 }
 0x216   :  { %v930_v27 = vpop.permute.xlu1 %929 }
 0x217   :  { %v936_v3 = vpop.permute.xlu0 %935  ;;  %947 = vst.msk [vmem:[%s3451_s4 + $0x50] sm:$0x1] %vm307_vm13, %v930_v27 }
 0x218   :  { %950 = vst.msk [vmem:[%s3451_s4 + $0x98] sm:$0x1] %vm307_vm13, %v936_v3 }
 0x21a   :  { %v934_v36 = vpop.permute.xlu1 %933 }
 0x21b   :  { %v1036_v0 = vpop.permute.xlu0 %1035  ;;  %949 = vst.msk [vmem:[%s3451_s4 + $0x80] sm:$0x1] %vm307_vm13, %v934_v36 }
 0x21c   :  { %1053 = vst.msk [vmem:[%s3451_s4 + $0x51] sm:$0x1] %vm307_vm13, %v1036_v0 }
 0x21e   :  { %v1042_v37 = vpop.permute.xlu1 %1041 }
 0x21f   :  { %v1040_v15 = vpop.permute.xlu0 %1039  ;;  %1056 = vst.msk [vmem:[%s3451_s4 + $0x99] sm:$0x1] %vm307_vm13, %v1042_v37 }
 0x220   :  { %1055 = vst.msk [vmem:[%s3451_s4 + $0x81] sm:$0x1] %vm307_vm13, %v1040_v15 }
 0x222   :  { %v1142_v23 = vpop.permute.xlu1 %1141 }
 0x223   :  { %v1148_v13 = vpop.permute.xlu0 %1147  ;;  %1159 = vst.msk [vmem:[%s3451_s4 + $0x52] sm:$0x1] %vm307_vm13, %v1142_v23 }
 0x224   :  { %1162 = vst.msk [vmem:[%s3451_s4 + $0x9a] sm:$0x1] %vm307_vm13, %v1148_v13 }
 0x226   :  { %v1146_v30 = vpop.permute.xlu1 %1145 }
 0x227   :  { %v1248_v28 = vpop.permute.xlu0 %1247  ;;  %1161 = vst.msk [vmem:[%s3451_s4 + $0x82] sm:$0x1] %vm307_vm13, %v1146_v30 }
 0x228   :  { %1265 = vst.msk [vmem:[%s3451_s4 + $0x53] sm:$0x1] %vm307_vm13, %v1248_v28 }
 0x22a   :  { %v1254_v49 = vpop.permute.xlu1 %1253 }
 0x22b   :  { %v1252_v17 = vpop.permute.xlu0 %1251  ;;  %1268 = vst.msk [vmem:[%s3451_s4 + $0x9b] sm:$0x1] %vm307_vm13, %v1254_v49 }
 0x22c   :  { %1267 = vst.msk [vmem:[%s3451_s4 + $0x83] sm:$0x1] %vm307_vm13, %v1252_v17 }
 0x22e   :  { %v1354_v40 = vpop.permute.xlu1 %1353 }
 0x22f   :  { %v1360_v62 = vpop.permute.xlu0 %1359  ;;  %1371 = vst.msk [vmem:[%s3451_s4 + $0x54] sm:$0x1] %vm307_vm13, %v1354_v40 }
 0x230   :  { %1374 = vst.msk [vmem:[%s3451_s4 + $0x9c] sm:$0x1] %vm307_vm13, %v1360_v62 }
 0x232   :  { %v1358_v45 = vpop.permute.xlu1 %1357 }
 0x233   :  { %v1460_v54 = vpop.permute.xlu0 %1459  ;;  %1373 = vst.msk [vmem:[%s3451_s4 + $0x84] sm:$0x1] %vm307_vm13, %v1358_v45 }
 0x234   :  { %1477 = vst.msk [vmem:[%s3451_s4 + $0x55] sm:$0x1] %vm307_vm13, %v1460_v54 }
 0x236   :  { %v1466_v57 = vpop.permute.xlu1 %1465 }
 0x237   :  { %v1464_v10 = vpop.permute.xlu0 %1463  ;;  %1480 = vst.msk [vmem:[%s3451_s4 + $0x9d] sm:$0x1] %vm307_vm13, %v1466_v57 }
 0x238   :  { %1479 = vst.msk [vmem:[%s3451_s4 + $0x85] sm:$0x1] %vm307_vm13, %v1464_v10 }
 0x23a   :  { %v1566_v58 = vpop.permute.xlu1 %1565 }
 0x23b   :  { %v1572_v51 = vpop.permute.xlu0 %1571  ;;  %1583 = vst.msk [vmem:[%s3451_s4 + $0x56] sm:$0x1] %vm307_vm13, %v1566_v58 }
 0x23c   :  { %1586 = vst.msk [vmem:[%s3451_s4 + $0x9e] sm:$0x1] %vm307_vm13, %v1572_v51 }
 0x23e   :  { %v1570_v55 = vpop.permute.xlu1 %1569 }
 0x23f   :  { %v1672_v9 = vpop.permute.xlu0 %1671  ;;  %1585 = vst.msk [vmem:[%s3451_s4 + $0x86] sm:$0x1] %vm307_vm13, %v1570_v55 }
 0x240   :  { %1689 = vst.msk [vmem:[%s3451_s4 + $0x57] sm:$0x1] %vm307_vm13, %v1672_v9 }
 0x242   :  { %v1678_v22 = vpop.permute.xlu1 %1677 }
 0x243   :  { %v1676_v1 = vpop.permute.xlu0 %1675  ;;  %1692 = vst.msk [vmem:[%s3451_s4 + $0x9f] sm:$0x1] %vm307_vm13, %v1678_v22 }
 0x244   :  { %1691 = vst.msk [vmem:[%s3451_s4 + $0x87] sm:$0x1] %vm307_vm13, %v1676_v1 }
 0x246   :  { %v1778_v11 = vpop.permute.xlu1 %1777 }
 0x247   :  { %v1784_v38 = vpop.permute.xlu0 %1783  ;;  %1795 = vst.msk [vmem:[%s3451_s4 + $0x58] sm:$0x1] %vm307_vm13, %v1778_v11 }
 0x248   :  { %1798 = vst.msk [vmem:[%s3451_s4 + $0xa0] sm:$0x1] %vm307_vm13, %v1784_v38 }
 0x24a   :  { %v1782_v24 = vpop.permute.xlu1 %1781 }
 0x24b   :  { %v1884_v29 = vpop.permute.xlu0 %1883  ;;  %1797 = vst.msk [vmem:[%s3451_s4 + $0x88] sm:$0x1] %vm307_vm13, %v1782_v24 }
 0x24c   :  { %1901 = vst.msk [vmem:[%s3451_s4 + $0x59] sm:$0x1] %vm307_vm13, %v1884_v29 }
 0x24e   :  { %v1890_v59 = vpop.permute.xlu1 %1889 }
 0x24f   :  { %v1888_v7 = vpop.permute.xlu0 %1887  ;;  %1904 = vst.msk [vmem:[%s3451_s4 + $0xa1] sm:$0x1] %vm307_vm13, %v1890_v59 }
 0x250   :  { %1903 = vst.msk [vmem:[%s3451_s4 + $0x89] sm:$0x1] %vm307_vm13, %v1888_v7 }
 0x251   :  { %1909 = vsyncpa [#allocation5], 1 }

</bundles_post_ra>
